<compile_context>
chip_gen: v6e
topology: v6e:2x2x1
jax: 0.10.0
libtpu: 0.0.40
codegen_flags: <defaults>
</compile_context>

<pallas_src>
import jax
import jax.numpy as jnp
from jax import lax
from jax.experimental import pallas as pl
from jax.experimental.pallas import tpu as pltpu


# ----------------------------- fused Pallas kernel ----------------------------- #

def make_fused_kernel(T, B, H, num_layers):
    """Builds the fused (L x LSTM layer) + FC + sigmoid kernel for static shapes.

    Kernel ref signature (built positionally):
      inputs : x_flat [T*B, F],
               (w_ih [in, 4H], w_hh [H, 4H], bias [1, 4H]) * num_layers,
               w_fc [H, O], b_fc [1, O]
      output : out [B, O]
      scratch: seq_sc [T*B, H]   (inter-layer sequence ping buffer, VMEM)
               xg_sc  [T*B, 4H]  (hoisted fused input projection, VMEM, lane-dense)
    Gate ordering along the 4H lane axis is PyTorch's (i, f, g, o); bias = b_ih + b_hh.
    """
    H4 = 4 * H

    def kernel(*refs):
        idx = 0
        x_ref = refs[idx]; idx += 1
        layer_refs = []
        for _ in range(num_layers):
            layer_refs.append((refs[idx], refs[idx + 1], refs[idx + 2]))
            idx += 3
        wfc_ref, bfc_ref = refs[idx], refs[idx + 1]; idx += 2
        out_ref = refs[idx]; idx += 1
        seq_sc, xg_sc = refs[idx], refs[idx + 1]

        h = None
        for layer, (w_ih_ref, w_hh_ref, b_ref) in enumerate(layer_refs):
            is_first = layer == 0
            is_last = layer == num_layers - 1

            # Previous layer's full sequence (or the raw input) -- [T*B, in_dim].
            src = x_ref[...] if is_first else seq_sc[...]

            # ---- Phase 1 (hoisted out of the recurrence): fused input projection for
            #      ALL timesteps and ALL gates at once, bias folded in.  One
            #      [T*B, in] @ [in, 4H] matmul -> lane-dense [., 128] store.
            xg_sc[...] = (
                jnp.dot(src, w_ih_ref[...], preferred_element_type=jnp.float32)
                + b_ref[...]
            )

            # Fused hidden-to-hidden weights, loaded once per layer (outside the loop).
            whh = w_hh_ref[...]                       # [H, 4H]

            # ---- Phase 2: serial recurrence. T is small & static -> fully unrolled,
            #      giving the scheduler visibility to overlap the single per-step MXU
            #      push with neighboring steps' VPU/EUP gate math.
            c = None
            for t in range(T):
                r0 = t * B                            # sublane-aligned (B % 8 == 0)
                xg_t = xg_sc[r0:r0 + B, :]            # one contiguous [B, 4H] load

                if t == 0:
                    gates = xg_t                      # h0 == 0 -> skip the MXU issue
                else:
                    gates = xg_t + jnp.dot(h, whh, preferred_element_type=jnp.float32)

                # One wide sigmoid over the full fused tile, one tanh on the g slice.
                sig = jax.nn.sigmoid(gates)           # [B, 4H]
                i_g = sig[:, 0:H]
                f_g = sig[:, H:2 * H]
                o_g = sig[:, 3 * H:H4]
                g_g = jnp.tanh(gates[:, 2 * H:3 * H])

                if t == 0:
                    c = i_g * g_g                     # c0 == 0 -> drop the f*c term
                else:
                    c = f_g * c + i_g * g_g
                h = o_g * jnp.tanh(c)

                if not is_last:
                    # Only intermediate layers need the full sequence downstream.
                    seq_sc[r0:r0 + B, :] = h

        # ---- FC + sigmoid on the final hidden state (== out[:, -1, :]) ----
        logits = jnp.dot(h, wfc_ref[...], preferred_element_type=jnp.float32) + bfc_ref[...]
        out_ref[...] = jax.nn.sigmoid(logits)

    return kernel


# --------------------------------- JAX wrapper --------------------------------- #

def flood_landslide_lstm_forward(x, params):
    """x: [B, T, F] float32  ->  [B, output_size] float32 (sigmoid probabilities)."""
    B, T, F = x.shape
    B_pad = max(8, ((B + 7) // 8) * 8)  # pad batch to full sublanes

    # TODO(synk): at production T*B*F, fold this relayout into the kernel's DMA
    #             (time-major index_map) instead of a separate XLA pass.
    x_tm = jnp.transpose(x.astype(jnp.float32), (1, 0, 2))        # [T, B, F]
    if B_pad != B:
        x_tm = jnp.pad(x_tm, ((0, 0), (0, B_pad - B), (0, 0)))
    x_flat = x_tm.reshape(T * B_pad, F)                            # [T*B_pad, F]

    layers = params["lstm_layers"]
    w_fc, b_fc = params["fc"]
    H = layers[0][1].shape[0]            # w_hh is [H, 4H]
    O = w_fc.shape[1]
    num_layers = len(layers)

    args = [x_flat]
    for (w_ih, w_hh, b) in layers:
        args += [w_ih, w_hh, b]
    args += [w_fc, b_fc]

    kernel = make_fused_kernel(T, B_pad, H, num_layers)
    vmem_spec = pl.BlockSpec(memory_space=pltpu.MemorySpace.VMEM)

    out = pl.pallas_call(
        kernel,
        out_shape=jax.ShapeDtypeStruct((B_pad, O), jnp.float32),
        in_specs=[vmem_spec] * len(args),
        out_specs=vmem_spec,
        scratch_shapes=[
            pltpu.VMEM((T * B_pad, H), jnp.float32),       # inter-layer sequence buffer
            pltpu.VMEM((T * B_pad, 4 * H), jnp.float32),   # fused hoisted X @ W_ih + b
        ],
    )(*args)

    return out[:B]


# ------------------------------ parameter creation ------------------------------ #

def init_params(key, input_size, hidden_size, num_layers, output_size):
    """Synthetic params, gate-lane-fused layout.

    PyTorch stores W_ih:[4H, in], W_hh:[4H, H] with gates (i,f,g,o) stacked on dim 0.
    Here each layer stores the transposed, concatenated form:
      w_ih [in, 4H] == W_ih.T,  w_hh [H, 4H] == W_hh.T,  bias [1, 4H] == (b_ih + b_hh)
    so gate k occupies lane block [k*H, (k+1)*H).
    """
    scale = 1.0 / jnp.sqrt(jnp.float32(hidden_size))
    H4 = 4 * hidden_size
    layers = []
    in_dim = input_size
    for _ in range(num_layers):
        key, k1, k2, k3, k4 = jax.random.split(key, 5)
        w_ih = jax.random.uniform(k1, (in_dim, H4), jnp.float32, -scale, scale)
        w_hh = jax.random.uniform(k2, (hidden_size, H4), jnp.float32, -scale, scale)
        b_ih = jax.random.uniform(k3, (1, H4), jnp.float32, -scale, scale)
        b_hh = jax.random.uniform(k4, (1, H4), jnp.float32, -scale, scale)
        layers.append((w_ih, w_hh, b_ih + b_hh))
        in_dim = hidden_size

    key, k5, k6 = jax.random.split(key, 3)
    w_fc = jax.random.uniform(k5, (hidden_size, output_size), jnp.float32, -scale, scale)
    b_fc = jax.random.uniform(k6, (1, output_size), jnp.float32, -scale, scale)
    return {"lstm_layers": layers, "fc": (w_fc, b_fc)}


# ----------------------------------- reference ----------------------------------- #

def reference_forward(x, params):
    """Pure-JAX reference (lax.scan) matching PyTorch LSTM eval-mode semantics."""
    seq = jnp.transpose(x, (1, 0, 2)).astype(jnp.float32)          # [T, B, F]
    B = x.shape[0]
    hp = lax.Precision.HIGHEST
    for (w_ih, w_hh, b) in params["lstm_layers"]:
        H = w_hh.shape[0]

        def step(carry, x_t):
            h, c = carry
            gates = (jnp.dot(x_t, w_ih, precision=hp)
                     + jnp.dot(h, w_hh, precision=hp) + b)          # [B, 4H]
            i_g = jax.nn.sigmoid(gates[:, 0:H])
            f_g = jax.nn.sigmoid(gates[:, H:2 * H])
            g_g = jnp.tanh(gates[:, 2 * H:3 * H])
            o_g = jax.nn.sigmoid(gates[:, 3 * H:4 * H])
            c_new = f_g * c + i_g * g_g
            h_new = o_g * jnp.tanh(c_new)
            return (h_new, c_new), h_new

        init = (jnp.zeros((B, H), jnp.float32), jnp.zeros((B, H), jnp.float32))
        _, seq = lax.scan(step, init, seq)

    h_last = seq[-1]
    w_fc, b_fc = params["fc"]
    return jax.nn.sigmoid(jnp.dot(h_last, w_fc, precision=hp) + b_fc)


# -------------------------------------- main -------------------------------------- #

if __name__ == "__main__":
    batch, seq_len = 2, 8
    input_size, hidden_size, num_layers, output_size = 4, 32, 2, 2

    key = jax.random.PRNGKey(0)
    key, kx, kp = jax.random.split(key, 3)
    x = jax.random.normal(kx, (batch, seq_len, input_size), dtype=jnp.float32)
    params = init_params(kp, input_size, hidden_size, num_layers, output_size)

    out = flood_landslide_lstm_forward(x, params)
    out = jax.block_until_ready(out)

    ref = reference_forward(x, params)
    assert out.shape == (batch, output_size)
    err = jnp.max(jnp.abs(out - ref))
    assert jnp.allclose(out, ref, atol=1e-4, rtol=1e-4), (out, ref, err)

    print("KERNEL_OK")
</pallas_src>

<mosaic_0001>
module attributes {stable_mosaic.version = 11 : i64} {
  func.func @kernel(%arg0: memref<64x4xf32, #tpu.memory_space<vmem>>, %arg1: memref<4x128xf32, #tpu.memory_space<vmem>>, %arg2: memref<32x128xf32, #tpu.memory_space<vmem>>, %arg3: memref<1x128xf32, #tpu.memory_space<vmem>>, %arg4: memref<32x128xf32, #tpu.memory_space<vmem>>, %arg5: memref<32x128xf32, #tpu.memory_space<vmem>>, %arg6: memref<1x128xf32, #tpu.memory_space<vmem>>, %arg7: memref<32x2xf32, #tpu.memory_space<vmem>>, %arg8: memref<1x2xf32, #tpu.memory_space<vmem>>, %arg9: memref<8x2xf32, #tpu.memory_space<vmem>>, %arg10: memref<64x32xf32, #tpu.memory_space<vmem>>, %arg11: memref<64x128xf32, #tpu.memory_space<vmem>>) attributes {dimension_semantics = [], scalar_prefetch = 0 : i64, scratch_operands = 2 : i64, tpu.core_type = #tpu.core_type<tc>} {
    %c0 = arith.constant 0 : index
    %c0_0 = arith.constant 0 : index
    %0 = vector.load %arg0[%c0, %c0_0] : memref<64x4xf32, #tpu.memory_space<vmem>>, vector<64x4xf32>
    %c0_1 = arith.constant 0 : index
    %c0_2 = arith.constant 0 : index
    %1 = vector.load %arg1[%c0_1, %c0_2] : memref<4x128xf32, #tpu.memory_space<vmem>>, vector<4x128xf32>
    %cst = arith.constant dense<0.000000e+00> : vector<64x128xf32>
    %2 = tpu.matmul %0, %1, %cst {dimension_numbers = #tpu.dot_dimension_numbers<[1], [0], [0], [1], [0, 0, 1, 1], [], []>} : vector<64x4xf32>, vector<4x128xf32>, vector<64x128xf32> -> vector<64x128xf32>
    %c0_3 = arith.constant 0 : index
    %c0_4 = arith.constant 0 : index
    %3 = vector.load %arg3[%c0_3, %c0_4] : memref<1x128xf32, #tpu.memory_space<vmem>>, vector<1x128xf32>
    %4 = vector.broadcast %3 : vector<1x128xf32> to vector<64x128xf32>
    %5 = arith.addf %2, %4 : vector<64x128xf32>
    %c0_5 = arith.constant 0 : index
    %c0_6 = arith.constant 0 : index
    %6 = vector.load %arg11[%c0_5, %c0_6] : memref<64x128xf32, #tpu.memory_space<vmem>>, vector<64x128xf32>
    tpu.vector_store %arg11[%c0_5, %c0_6], %5 {strides = array<i32>} : memref<64x128xf32, #tpu.memory_space<vmem>>, vector<64x128xf32>,
    %c0_7 = arith.constant 0 : index
    %c0_8 = arith.constant 0 : index
    %7 = vector.load %arg2[%c0_7, %c0_8] : memref<32x128xf32, #tpu.memory_space<vmem>>, vector<32x128xf32>
    %c0_9 = arith.constant 0 : index
    %c0_10 = arith.constant 0 : index
    %8 = vector.load %arg11[%c0_9, %c0_10] : memref<64x128xf32, #tpu.memory_space<vmem>>, vector<8x128xf32>
    %9 = arith.negf %8 : vector<8x128xf32>
    %10 = math.exp %9 : vector<8x128xf32>
    %cst_11 = arith.constant 1.000000e+00 : f32
    %11 = vector.broadcast %cst_11 : f32 to vector<8x128xf32>
    %12 = arith.addf %11, %10 : vector<8x128xf32>
    %13 = arith.divf %11, %12 : vector<8x128xf32>
    %14 = vector.extract_strided_slice %13 {offsets = [0, 0], sizes = [8, 32], strides = [1, 1]} : vector<8x128xf32> to vector<8x32xf32>
    %15 = vector.extract_strided_slice %13 {offsets = [0, 96], sizes = [8, 32], strides = [1, 1]} : vector<8x128xf32> to vector<8x32xf32>
    %16 = vector.extract_strided_slice %8 {offsets = [0, 64], sizes = [8, 32], strides = [1, 1]} : vector<8x128xf32> to vector<8x32xf32>
    %17 = math.tanh %16 : vector<8x32xf32>
    %18 = arith.mulf %14, %17 : vector<8x32xf32>
    %19 = math.tanh %18 : vector<8x32xf32>
    %20 = arith.mulf %15, %19 : vector<8x32xf32>
    %c0_12 = arith.constant 0 : index
    %c0_13 = arith.constant 0 : index
    %21 = vector.load %arg10[%c0_12, %c0_13] : memref<64x32xf32, #tpu.memory_space<vmem>>, vector<8x32xf32>
    tpu.vector_store %arg10[%c0_12, %c0_13], %20 {strides = array<i32>} : memref<64x32xf32, #tpu.memory_space<vmem>>, vector<8x32xf32>,
    %c8 = arith.constant 8 : index
    %c0_14 = arith.constant 0 : index
    %22 = vector.load %arg11[%c8, %c0_14] : memref<64x128xf32, #tpu.memory_space<vmem>>, vector<8x128xf32>
    %cst_15 = arith.constant dense<0.000000e+00> : vector<8x128xf32>
    %23 = tpu.matmul %20, %7, %cst_15 {dimension_numbers = #tpu.dot_dimension_numbers<[1], [0], [0], [1], [0, 0, 1, 1], [], []>} : vector<8x32xf32>, vector<32x128xf32>, vector<8x128xf32> -> vector<8x128xf32>
    %24 = arith.addf %22, %23 : vector<8x128xf32>
    %25 = arith.negf %24 : vector<8x128xf32>
    %26 = math.exp %25 : vector<8x128xf32>
    %cst_16 = arith.constant 1.000000e+00 : f32
    %27 = vector.broadcast %cst_16 : f32 to vector<8x128xf32>
    %28 = arith.addf %27, %26 : vector<8x128xf32>
    %29 = arith.divf %27, %28 : vector<8x128xf32>
    %30 = vector.extract_strided_slice %29 {offsets = [0, 0], sizes = [8, 32], strides = [1, 1]} : vector<8x128xf32> to vector<8x32xf32>
    %31 = vector.extract_strided_slice %29 {offsets = [0, 32], sizes = [8, 32], strides = [1, 1]} : vector<8x128xf32> to vector<8x32xf32>
    %32 = vector.extract_strided_slice %29 {offsets = [0, 96], sizes = [8, 32], strides = [1, 1]} : vector<8x128xf32> to vector<8x32xf32>
    %33 = vector.extract_strided_slice %24 {offsets = [0, 64], sizes = [8, 32], strides = [1, 1]} : vector<8x128xf32> to vector<8x32xf32>
    %34 = math.tanh %33 : vector<8x32xf32>
    %35 = arith.mulf %31, %18 : vector<8x32xf32>
    %36 = arith.mulf %30, %34 : vector<8x32xf32>
    %37 = arith.addf %35, %36 : vector<8x32xf32>
    %38 = math.tanh %37 : vector<8x32xf32>
    %39 = arith.mulf %32, %38 : vector<8x32xf32>
    %c8_17 = arith.constant 8 : index
    %c0_18 = arith.constant 0 : index
    %40 = vector.load %arg10[%c8_17, %c0_18] : memref<64x32xf32, #tpu.memory_space<vmem>>, vector<8x32xf32>
    tpu.vector_store %arg10[%c8_17, %c0_18], %39 {strides = array<i32>} : memref<64x32xf32, #tpu.memory_space<vmem>>, vector<8x32xf32>,
    %c16 = arith.constant 16 : index
    %c0_19 = arith.constant 0 : index
    %41 = vector.load %arg11[%c16, %c0_19] : memref<64x128xf32, #tpu.memory_space<vmem>>, vector<8x128xf32>
    %cst_20 = arith.constant dense<0.000000e+00> : vector<8x128xf32>
    %42 = tpu.matmul %39, %7, %cst_20 {dimension_numbers = #tpu.dot_dimension_numbers<[1], [0], [0], [1], [0, 0, 1, 1], [], []>} : vector<8x32xf32>, vector<32x128xf32>, vector<8x128xf32> -> vector<8x128xf32>
    %43 = arith.addf %41, %42 : vector<8x128xf32>
    %44 = arith.negf %43 : vector<8x128xf32>
    %45 = math.exp %44 : vector<8x128xf32>
    %cst_21 = arith.constant 1.000000e+00 : f32
    %46 = vector.broadcast %cst_21 : f32 to vector<8x128xf32>
    %47 = arith.addf %46, %45 : vector<8x128xf32>
    %48 = arith.divf %46, %47 : vector<8x128xf32>
    %49 = vector.extract_strided_slice %48 {offsets = [0, 0], sizes = [8, 32], strides = [1, 1]} : vector<8x128xf32> to vector<8x32xf32>
    %50 = vector.extract_strided_slice %48 {offsets = [0, 32], sizes = [8, 32], strides = [1, 1]} : vector<8x128xf32> to vector<8x32xf32>
    %51 = vector.extract_strided_slice %48 {offsets = [0, 96], sizes = [8, 32], strides = [1, 1]} : vector<8x128xf32> to vector<8x32xf32>
    %52 = vector.extract_strided_slice %43 {offsets = [0, 64], sizes = [8, 32], strides = [1, 1]} : vector<8x128xf32> to vector<8x32xf32>
    %53 = math.tanh %52 : vector<8x32xf32>
    %54 = arith.mulf %50, %37 : vector<8x32xf32>
    %55 = arith.mulf %49, %53 : vector<8x32xf32>
    %56 = arith.addf %54, %55 : vector<8x32xf32>
    %57 = math.tanh %56 : vector<8x32xf32>
    %58 = arith.mulf %51, %57 : vector<8x32xf32>
    %c16_22 = arith.constant 16 : index
    %c0_23 = arith.constant 0 : index
    %59 = vector.load %arg10[%c16_22, %c0_23] : memref<64x32xf32, #tpu.memory_space<vmem>>, vector<8x32xf32>
    tpu.vector_store %arg10[%c16_22, %c0_23], %58 {strides = array<i32>} : memref<64x32xf32, #tpu.memory_space<vmem>>, vector<8x32xf32>,
    %c24 = arith.constant 24 : index
    %c0_24 = arith.constant 0 : index
    %60 = vector.load %arg11[%c24, %c0_24] : memref<64x128xf32, #tpu.memory_space<vmem>>, vector<8x128xf32>
    %cst_25 = arith.constant dense<0.000000e+00> : vector<8x128xf32>
    %61 = tpu.matmul %58, %7, %cst_25 {dimension_numbers = #tpu.dot_dimension_numbers<[1], [0], [0], [1], [0, 0, 1, 1], [], []>} : vector<8x32xf32>, vector<32x128xf32>, vector<8x128xf32> -> vector<8x128xf32>
    %62 = arith.addf %60, %61 : vector<8x128xf32>
    %63 = arith.negf %62 : vector<8x128xf32>
    %64 = math.exp %63 : vector<8x128xf32>
    %cst_26 = arith.constant 1.000000e+00 : f32
    %65 = vector.broadcast %cst_26 : f32 to vector<8x128xf32>
    %66 = arith.addf %65, %64 : vector<8x128xf32>
    %67 = arith.divf %65, %66 : vector<8x128xf32>
    %68 = vector.extract_strided_slice %67 {offsets = [0, 0], sizes = [8, 32], strides = [1, 1]} : vector<8x128xf32> to vector<8x32xf32>
    %69 = vector.extract_strided_slice %67 {offsets = [0, 32], sizes = [8, 32], strides = [1, 1]} : vector<8x128xf32> to vector<8x32xf32>
    %70 = vector.extract_strided_slice %67 {offsets = [0, 96], sizes = [8, 32], strides = [1, 1]} : vector<8x128xf32> to vector<8x32xf32>
    %71 = vector.extract_strided_slice %62 {offsets = [0, 64], sizes = [8, 32], strides = [1, 1]} : vector<8x128xf32> to vector<8x32xf32>
    %72 = math.tanh %71 : vector<8x32xf32>
    %73 = arith.mulf %69, %56 : vector<8x32xf32>
    %74 = arith.mulf %68, %72 : vector<8x32xf32>
    %75 = arith.addf %73, %74 : vector<8x32xf32>
    %76 = math.tanh %75 : vector<8x32xf32>
    %77 = arith.mulf %70, %76 : vector<8x32xf32>
    %c24_27 = arith.constant 24 : index
    %c0_28 = arith.constant 0 : index
    %78 = vector.load %arg10[%c24_27, %c0_28] : memref<64x32xf32, #tpu.memory_space<vmem>>, vector<8x32xf32>
    tpu.vector_store %arg10[%c24_27, %c0_28], %77 {strides = array<i32>} : memref<64x32xf32, #tpu.memory_space<vmem>>, vector<8x32xf32>,
    %c32 = arith.constant 32 : index
    %c0_29 = arith.constant 0 : index
    %79 = vector.load %arg11[%c32, %c0_29] : memref<64x128xf32, #tpu.memory_space<vmem>>, vector<8x128xf32>
    %cst_30 = arith.constant dense<0.000000e+00> : vector<8x128xf32>
    %80 = tpu.matmul %77, %7, %cst_30 {dimension_numbers = #tpu.dot_dimension_numbers<[1], [0], [0], [1], [0, 0, 1, 1], [], []>} : vector<8x32xf32>, vector<32x128xf32>, vector<8x128xf32> -> vector<8x128xf32>
    %81 = arith.addf %79, %80 : vector<8x128xf32>
    %82 = arith.negf %81 : vector<8x128xf32>
    %83 = math.exp %82 : vector<8x128xf32>
    %cst_31 = arith.constant 1.000000e+00 : f32
    %84 = vector.broadcast %cst_31 : f32 to vector<8x128xf32>
    %85 = arith.addf %84, %83 : vector<8x128xf32>
    %86 = arith.divf %84, %85 : vector<8x128xf32>
    %87 = vector.extract_strided_slice %86 {offsets = [0, 0], sizes = [8, 32], strides = [1, 1]} : vector<8x128xf32> to vector<8x32xf32>
    %88 = vector.extract_strided_slice %86 {offsets = [0, 32], sizes = [8, 32], strides = [1, 1]} : vector<8x128xf32> to vector<8x32xf32>
    %89 = vector.extract_strided_slice %86 {offsets = [0, 96], sizes = [8, 32], strides = [1, 1]} : vector<8x128xf32> to vector<8x32xf32>
    %90 = vector.extract_strided_slice %81 {offsets = [0, 64], sizes = [8, 32], strides = [1, 1]} : vector<8x128xf32> to vector<8x32xf32>
    %91 = math.tanh %90 : vector<8x32xf32>
    %92 = arith.mulf %88, %75 : vector<8x32xf32>
    %93 = arith.mulf %87, %91 : vector<8x32xf32>
    %94 = arith.addf %92, %93 : vector<8x32xf32>
    %95 = math.tanh %94 : vector<8x32xf32>
    %96 = arith.mulf %89, %95 : vector<8x32xf32>
    %c32_32 = arith.constant 32 : index
    %c0_33 = arith.constant 0 : index
    %97 = vector.load %arg10[%c32_32, %c0_33] : memref<64x32xf32, #tpu.memory_space<vmem>>, vector<8x32xf32>
    tpu.vector_store %arg10[%c32_32, %c0_33], %96 {strides = array<i32>} : memref<64x32xf32, #tpu.memory_space<vmem>>, vector<8x32xf32>,
    %c40 = arith.constant 40 : index
    %c0_34 = arith.constant 0 : index
    %98 = vector.load %arg11[%c40, %c0_34] : memref<64x128xf32, #tpu.memory_space<vmem>>, vector<8x128xf32>
    %cst_35 = arith.constant dense<0.000000e+00> : vector<8x128xf32>
    %99 = tpu.matmul %96, %7, %cst_35 {dimension_numbers = #tpu.dot_dimension_numbers<[1], [0], [0], [1], [0, 0, 1, 1], [], []>} : vector<8x32xf32>, vector<32x128xf32>, vector<8x128xf32> -> vector<8x128xf32>
    %100 = arith.addf %98, %99 : vector<8x128xf32>
    %101 = arith.negf %100 : vector<8x128xf32>
    %102 = math.exp %101 : vector<8x128xf32>
    %cst_36 = arith.constant 1.000000e+00 : f32
    %103 = vector.broadcast %cst_36 : f32 to vector<8x128xf32>
    %104 = arith.addf %103, %102 : vector<8x128xf32>
    %105 = arith.divf %103, %104 : vector<8x128xf32>
    %106 = vector.extract_strided_slice %105 {offsets = [0, 0], sizes = [8, 32], strides = [1, 1]} : vector<8x128xf32> to vector<8x32xf32>
    %107 = vector.extract_strided_slice %105 {offsets = [0, 32], sizes = [8, 32], strides = [1, 1]} : vector<8x128xf32> to vector<8x32xf32>
    %108 = vector.extract_strided_slice %105 {offsets = [0, 96], sizes = [8, 32], strides = [1, 1]} : vector<8x128xf32> to vector<8x32xf32>
    %109 = vector.extract_strided_slice %100 {offsets = [0, 64], sizes = [8, 32], strides = [1, 1]} : vector<8x128xf32> to vector<8x32xf32>
    %110 = math.tanh %109 : vector<8x32xf32>
    %111 = arith.mulf %107, %94 : vector<8x32xf32>
    %112 = arith.mulf %106, %110 : vector<8x32xf32>
    %113 = arith.addf %111, %112 : vector<8x32xf32>
    %114 = math.tanh %113 : vector<8x32xf32>
    %115 = arith.mulf %108, %114 : vector<8x32xf32>
    %c40_37 = arith.constant 40 : index
    %c0_38 = arith.constant 0 : index
    %116 = vector.load %arg10[%c40_37, %c0_38] : memref<64x32xf32, #tpu.memory_space<vmem>>, vector<8x32xf32>
    tpu.vector_store %arg10[%c40_37, %c0_38], %115 {strides = array<i32>} : memref<64x32xf32, #tpu.memory_space<vmem>>, vector<8x32xf32>,
    %c48 = arith.constant 48 : index
    %c0_39 = arith.constant 0 : index
    %117 = vector.load %arg11[%c48, %c0_39] : memref<64x128xf32, #tpu.memory_space<vmem>>, vector<8x128xf32>
    %cst_40 = arith.constant dense<0.000000e+00> : vector<8x128xf32>
    %118 = tpu.matmul %115, %7, %cst_40 {dimension_numbers = #tpu.dot_dimension_numbers<[1], [0], [0], [1], [0, 0, 1, 1], [], []>} : vector<8x32xf32>, vector<32x128xf32>, vector<8x128xf32> -> vector<8x128xf32>
    %119 = arith.addf %117, %118 : vector<8x128xf32>
    %120 = arith.negf %119 : vector<8x128xf32>
    %121 = math.exp %120 : vector<8x128xf32>
    %cst_41 = arith.constant 1.000000e+00 : f32
    %122 = vector.broadcast %cst_41 : f32 to vector<8x128xf32>
    %123 = arith.addf %122, %121 : vector<8x128xf32>
    %124 = arith.divf %122, %123 : vector<8x128xf32>
    %125 = vector.extract_strided_slice %124 {offsets = [0, 0], sizes = [8, 32], strides = [1, 1]} : vector<8x128xf32> to vector<8x32xf32>
    %126 = vector.extract_strided_slice %124 {offsets = [0, 32], sizes = [8, 32], strides = [1, 1]} : vector<8x128xf32> to vector<8x32xf32>
    %127 = vector.extract_strided_slice %124 {offsets = [0, 96], sizes = [8, 32], strides = [1, 1]} : vector<8x128xf32> to vector<8x32xf32>
    %128 = vector.extract_strided_slice %119 {offsets = [0, 64], sizes = [8, 32], strides = [1, 1]} : vector<8x128xf32> to vector<8x32xf32>
    %129 = math.tanh %128 : vector<8x32xf32>
    %130 = arith.mulf %126, %113 : vector<8x32xf32>
    %131 = arith.mulf %125, %129 : vector<8x32xf32>
    %132 = arith.addf %130, %131 : vector<8x32xf32>
    %133 = math.tanh %132 : vector<8x32xf32>
    %134 = arith.mulf %127, %133 : vector<8x32xf32>
    %c48_42 = arith.constant 48 : index
    %c0_43 = arith.constant 0 : index
    %135 = vector.load %arg10[%c48_42, %c0_43] : memref<64x32xf32, #tpu.memory_space<vmem>>, vector<8x32xf32>
    tpu.vector_store %arg10[%c48_42, %c0_43], %134 {strides = array<i32>} : memref<64x32xf32, #tpu.memory_space<vmem>>, vector<8x32xf32>,
    %c56 = arith.constant 56 : index
    %c0_44 = arith.constant 0 : index
    %136 = vector.load %arg11[%c56, %c0_44] : memref<64x128xf32, #tpu.memory_space<vmem>>, vector<8x128xf32>
    %cst_45 = arith.constant dense<0.000000e+00> : vector<8x128xf32>
    %137 = tpu.matmul %134, %7, %cst_45 {dimension_numbers = #tpu.dot_dimension_numbers<[1], [0], [0], [1], [0, 0, 1, 1], [], []>} : vector<8x32xf32>, vector<32x128xf32>, vector<8x128xf32> -> vector<8x128xf32>
    %138 = arith.addf %136, %137 : vector<8x128xf32>
    %139 = arith.negf %138 : vector<8x128xf32>
    %140 = math.exp %139 : vector<8x128xf32>
    %cst_46 = arith.constant 1.000000e+00 : f32
    %141 = vector.broadcast %cst_46 : f32 to vector<8x128xf32>
    %142 = arith.addf %141, %140 : vector<8x128xf32>
    %143 = arith.divf %141, %142 : vector<8x128xf32>
    %144 = vector.extract_strided_slice %143 {offsets = [0, 0], sizes = [8, 32], strides = [1, 1]} : vector<8x128xf32> to vector<8x32xf32>
    %145 = vector.extract_strided_slice %143 {offsets = [0, 32], sizes = [8, 32], strides = [1, 1]} : vector<8x128xf32> to vector<8x32xf32>
    %146 = vector.extract_strided_slice %143 {offsets = [0, 96], sizes = [8, 32], strides = [1, 1]} : vector<8x128xf32> to vector<8x32xf32>
    %147 = vector.extract_strided_slice %138 {offsets = [0, 64], sizes = [8, 32], strides = [1, 1]} : vector<8x128xf32> to vector<8x32xf32>
    %148 = math.tanh %147 : vector<8x32xf32>
    %149 = arith.mulf %145, %132 : vector<8x32xf32>
    %150 = arith.mulf %144, %148 : vector<8x32xf32>
    %151 = arith.addf %149, %150 : vector<8x32xf32>
    %152 = math.tanh %151 : vector<8x32xf32>
    %153 = arith.mulf %146, %152 : vector<8x32xf32>
    %c56_47 = arith.constant 56 : index
    %c0_48 = arith.constant 0 : index
    %154 = vector.load %arg10[%c56_47, %c0_48] : memref<64x32xf32, #tpu.memory_space<vmem>>, vector<8x32xf32>
    tpu.vector_store %arg10[%c56_47, %c0_48], %153 {strides = array<i32>} : memref<64x32xf32, #tpu.memory_space<vmem>>, vector<8x32xf32>,
    %c0_49 = arith.constant 0 : index
    %c0_50 = arith.constant 0 : index
    %155 = vector.load %arg10[%c0_49, %c0_50] : memref<64x32xf32, #tpu.memory_space<vmem>>, vector<64x32xf32>
    %c0_51 = arith.constant 0 : index
    %c0_52 = arith.constant 0 : index
    %156 = vector.load %arg4[%c0_51, %c0_52] : memref<32x128xf32, #tpu.memory_space<vmem>>, vector<32x128xf32>
    %cst_53 = arith.constant dense<0.000000e+00> : vector<64x128xf32>
    %157 = tpu.matmul %155, %156, %cst_53 {dimension_numbers = #tpu.dot_dimension_numbers<[1], [0], [0], [1], [0, 0, 1, 1], [], []>} : vector<64x32xf32>, vector<32x128xf32>, vector<64x128xf32> -> vector<64x128xf32>
    %c0_54 = arith.constant 0 : index
    %c0_55 = arith.constant 0 : index
    %158 = vector.load %arg6[%c0_54, %c0_55] : memref<1x128xf32, #tpu.memory_space<vmem>>, vector<1x128xf32>
    %159 = vector.broadcast %158 : vector<1x128xf32> to vector<64x128xf32>
    %160 = arith.addf %157, %159 : vector<64x128xf32>
    %c0_56 = arith.constant 0 : index
    %c0_57 = arith.constant 0 : index
    %161 = vector.load %arg11[%c0_56, %c0_57] : memref<64x128xf32, #tpu.memory_space<vmem>>, vector<64x128xf32>
    tpu.vector_store %arg11[%c0_56, %c0_57], %160 {strides = array<i32>} : memref<64x128xf32, #tpu.memory_space<vmem>>, vector<64x128xf32>,
    %c0_58 = arith.constant 0 : index
    %c0_59 = arith.constant 0 : index
    %162 = vector.load %arg5[%c0_58, %c0_59] : memref<32x128xf32, #tpu.memory_space<vmem>>, vector<32x128xf32>
    %c0_60 = arith.constant 0 : index
    %c0_61 = arith.constant 0 : index
    %163 = vector.load %arg11[%c0_60, %c0_61] : memref<64x128xf32, #tpu.memory_space<vmem>>, vector<8x128xf32>
    %164 = arith.negf %163 : vector<8x128xf32>
    %165 = math.exp %164 : vector<8x128xf32>
    %cst_62 = arith.constant 1.000000e+00 : f32
    %166 = vector.broadcast %cst_62 : f32 to vector<8x128xf32>
    %167 = arith.addf %166, %165 : vector<8x128xf32>
    %168 = arith.divf %166, %167 : vector<8x128xf32>
    %169 = vector.extract_strided_slice %168 {offsets = [0, 0], sizes = [8, 32], strides = [1, 1]} : vector<8x128xf32> to vector<8x32xf32>
    %170 = vector.extract_strided_slice %168 {offsets = [0, 96], sizes = [8, 32], strides = [1, 1]} : vector<8x128xf32> to vector<8x32xf32>
    %171 = vector.extract_strided_slice %163 {offsets = [0, 64], sizes = [8, 32], strides = [1, 1]} : vector<8x128xf32> to vector<8x32xf32>
    %172 = math.tanh %171 : vector<8x32xf32>
    %173 = arith.mulf %169, %172 : vector<8x32xf32>
    %174 = math.tanh %173 : vector<8x32xf32>
    %175 = arith.mulf %170, %174 : vector<8x32xf32>
    %c8_63 = arith.constant 8 : index
    %c0_64 = arith.constant 0 : index
    %176 = vector.load %arg11[%c8_63, %c0_64] : memref<64x128xf32, #tpu.memory_space<vmem>>, vector<8x128xf32>
    %cst_65 = arith.constant dense<0.000000e+00> : vector<8x128xf32>
    %177 = tpu.matmul %175, %162, %cst_65 {dimension_numbers = #tpu.dot_dimension_numbers<[1], [0], [0], [1], [0, 0, 1, 1], [], []>} : vector<8x32xf32>, vector<32x128xf32>, vector<8x128xf32> -> vector<8x128xf32>
    %178 = arith.addf %176, %177 : vector<8x128xf32>
    %179 = arith.negf %178 : vector<8x128xf32>
    %180 = math.exp %179 : vector<8x128xf32>
    %cst_66 = arith.constant 1.000000e+00 : f32
    %181 = vector.broadcast %cst_66 : f32 to vector<8x128xf32>
    %182 = arith.addf %181, %180 : vector<8x128xf32>
    %183 = arith.divf %181, %182 : vector<8x128xf32>
    %184 = vector.extract_strided_slice %183 {offsets = [0, 0], sizes = [8, 32], strides = [1, 1]} : vector<8x128xf32> to vector<8x32xf32>
    %185 = vector.extract_strided_slice %183 {offsets = [0, 32], sizes = [8, 32], strides = [1, 1]} : vector<8x128xf32> to vector<8x32xf32>
    %186 = vector.extract_strided_slice %183 {offsets = [0, 96], sizes = [8, 32], strides = [1, 1]} : vector<8x128xf32> to vector<8x32xf32>
    %187 = vector.extract_strided_slice %178 {offsets = [0, 64], sizes = [8, 32], strides = [1, 1]} : vector<8x128xf32> to vector<8x32xf32>
    %188 = math.tanh %187 : vector<8x32xf32>
    %189 = arith.mulf %185, %173 : vector<8x32xf32>
    %190 = arith.mulf %184, %188 : vector<8x32xf32>
    %191 = arith.addf %189, %190 : vector<8x32xf32>
    %192 = math.tanh %191 : vector<8x32xf32>
    %193 = arith.mulf %186, %192 : vector<8x32xf32>
    %c16_67 = arith.constant 16 : index
    %c0_68 = arith.constant 0 : index
    %194 = vector.load %arg11[%c16_67, %c0_68] : memref<64x128xf32, #tpu.memory_space<vmem>>, vector<8x128xf32>
    %cst_69 = arith.constant dense<0.000000e+00> : vector<8x128xf32>
    %195 = tpu.matmul %193, %162, %cst_69 {dimension_numbers = #tpu.dot_dimension_numbers<[1], [0], [0], [1], [0, 0, 1, 1], [], []>} : vector<8x32xf32>, vector<32x128xf32>, vector<8x128xf32> -> vector<8x128xf32>
    %196 = arith.addf %194, %195 : vector<8x128xf32>
    %197 = arith.negf %196 : vector<8x128xf32>
    %198 = math.exp %197 : vector<8x128xf32>
    %cst_70 = arith.constant 1.000000e+00 : f32
    %199 = vector.broadcast %cst_70 : f32 to vector<8x128xf32>
    %200 = arith.addf %199, %198 : vector<8x128xf32>
    %201 = arith.divf %199, %200 : vector<8x128xf32>
    %202 = vector.extract_strided_slice %201 {offsets = [0, 0], sizes = [8, 32], strides = [1, 1]} : vector<8x128xf32> to vector<8x32xf32>
    %203 = vector.extract_strided_slice %201 {offsets = [0, 32], sizes = [8, 32], strides = [1, 1]} : vector<8x128xf32> to vector<8x32xf32>
    %204 = vector.extract_strided_slice %201 {offsets = [0, 96], sizes = [8, 32], strides = [1, 1]} : vector<8x128xf32> to vector<8x32xf32>
    %205 = vector.extract_strided_slice %196 {offsets = [0, 64], sizes = [8, 32], strides = [1, 1]} : vector<8x128xf32> to vector<8x32xf32>
    %206 = math.tanh %205 : vector<8x32xf32>
    %207 = arith.mulf %203, %191 : vector<8x32xf32>
    %208 = arith.mulf %202, %206 : vector<8x32xf32>
    %209 = arith.addf %207, %208 : vector<8x32xf32>
    %210 = math.tanh %209 : vector<8x32xf32>
    %211 = arith.mulf %204, %210 : vector<8x32xf32>
    %c24_71 = arith.constant 24 : index
    %c0_72 = arith.constant 0 : index
    %212 = vector.load %arg11[%c24_71, %c0_72] : memref<64x128xf32, #tpu.memory_space<vmem>>, vector<8x128xf32>
    %cst_73 = arith.constant dense<0.000000e+00> : vector<8x128xf32>
    %213 = tpu.matmul %211, %162, %cst_73 {dimension_numbers = #tpu.dot_dimension_numbers<[1], [0], [0], [1], [0, 0, 1, 1], [], []>} : vector<8x32xf32>, vector<32x128xf32>, vector<8x128xf32> -> vector<8x128xf32>
    %214 = arith.addf %212, %213 : vector<8x128xf32>
    %215 = arith.negf %214 : vector<8x128xf32>
    %216 = math.exp %215 : vector<8x128xf32>
    %cst_74 = arith.constant 1.000000e+00 : f32
    %217 = vector.broadcast %cst_74 : f32 to vector<8x128xf32>
    %218 = arith.addf %217, %216 : vector<8x128xf32>
    %219 = arith.divf %217, %218 : vector<8x128xf32>
    %220 = vector.extract_strided_slice %219 {offsets = [0, 0], sizes = [8, 32], strides = [1, 1]} : vector<8x128xf32> to vector<8x32xf32>
    %221 = vector.extract_strided_slice %219 {offsets = [0, 32], sizes = [8, 32], strides = [1, 1]} : vector<8x128xf32> to vector<8x32xf32>
    %222 = vector.extract_strided_slice %219 {offsets = [0, 96], sizes = [8, 32], strides = [1, 1]} : vector<8x128xf32> to vector<8x32xf32>
    %223 = vector.extract_strided_slice %214 {offsets = [0, 64], sizes = [8, 32], strides = [1, 1]} : vector<8x128xf32> to vector<8x32xf32>
    %224 = math.tanh %223 : vector<8x32xf32>
    %225 = arith.mulf %221, %209 : vector<8x32xf32>
    %226 = arith.mulf %220, %224 : vector<8x32xf32>
    %227 = arith.addf %225, %226 : vector<8x32xf32>
    %228 = math.tanh %227 : vector<8x32xf32>
    %229 = arith.mulf %222, %228 : vector<8x32xf32>
    %c32_75 = arith.constant 32 : index
    %c0_76 = arith.constant 0 : index
    %230 = vector.load %arg11[%c32_75, %c0_76] : memref<64x128xf32, #tpu.memory_space<vmem>>, vector<8x128xf32>
    %cst_77 = arith.constant dense<0.000000e+00> : vector<8x128xf32>
    %231 = tpu.matmul %229, %162, %cst_77 {dimension_numbers = #tpu.dot_dimension_numbers<[1], [0], [0], [1], [0, 0, 1, 1], [], []>} : vector<8x32xf32>, vector<32x128xf32>, vector<8x128xf32> -> vector<8x128xf32>
    %232 = arith.addf %230, %231 : vector<8x128xf32>
    %233 = arith.negf %232 : vector<8x128xf32>
    %234 = math.exp %233 : vector<8x128xf32>
    %cst_78 = arith.constant 1.000000e+00 : f32
    %235 = vector.broadcast %cst_78 : f32 to vector<8x128xf32>
    %236 = arith.addf %235, %234 : vector<8x128xf32>
    %237 = arith.divf %235, %236 : vector<8x128xf32>
    %238 = vector.extract_strided_slice %237 {offsets = [0, 0], sizes = [8, 32], strides = [1, 1]} : vector<8x128xf32> to vector<8x32xf32>
    %239 = vector.extract_strided_slice %237 {offsets = [0, 32], sizes = [8, 32], strides = [1, 1]} : vector<8x128xf32> to vector<8x32xf32>
    %240 = vector.extract_strided_slice %237 {offsets = [0, 96], sizes = [8, 32], strides = [1, 1]} : vector<8x128xf32> to vector<8x32xf32>
    %241 = vector.extract_strided_slice %232 {offsets = [0, 64], sizes = [8, 32], strides = [1, 1]} : vector<8x128xf32> to vector<8x32xf32>
    %242 = math.tanh %241 : vector<8x32xf32>
    %243 = arith.mulf %239, %227 : vector<8x32xf32>
    %244 = arith.mulf %238, %242 : vector<8x32xf32>
    %245 = arith.addf %243, %244 : vector<8x32xf32>
    %246 = math.tanh %245 : vector<8x32xf32>
    %247 = arith.mulf %240, %246 : vector<8x32xf32>
    %c40_79 = arith.constant 40 : index
    %c0_80 = arith.constant 0 : index
    %248 = vector.load %arg11[%c40_79, %c0_80] : memref<64x128xf32, #tpu.memory_space<vmem>>, vector<8x128xf32>
    %cst_81 = arith.constant dense<0.000000e+00> : vector<8x128xf32>
    %249 = tpu.matmul %247, %162, %cst_81 {dimension_numbers = #tpu.dot_dimension_numbers<[1], [0], [0], [1], [0, 0, 1, 1], [], []>} : vector<8x32xf32>, vector<32x128xf32>, vector<8x128xf32> -> vector<8x128xf32>
    %250 = arith.addf %248, %249 : vector<8x128xf32>
    %251 = arith.negf %250 : vector<8x128xf32>
    %252 = math.exp %251 : vector<8x128xf32>
    %cst_82 = arith.constant 1.000000e+00 : f32
    %253 = vector.broadcast %cst_82 : f32 to vector<8x128xf32>
    %254 = arith.addf %253, %252 : vector<8x128xf32>
    %255 = arith.divf %253, %254 : vector<8x128xf32>
    %256 = vector.extract_strided_slice %255 {offsets = [0, 0], sizes = [8, 32], strides = [1, 1]} : vector<8x128xf32> to vector<8x32xf32>
    %257 = vector.extract_strided_slice %255 {offsets = [0, 32], sizes = [8, 32], strides = [1, 1]} : vector<8x128xf32> to vector<8x32xf32>
    %258 = vector.extract_strided_slice %255 {offsets = [0, 96], sizes = [8, 32], strides = [1, 1]} : vector<8x128xf32> to vector<8x32xf32>
    %259 = vector.extract_strided_slice %250 {offsets = [0, 64], sizes = [8, 32], strides = [1, 1]} : vector<8x128xf32> to vector<8x32xf32>
    %260 = math.tanh %259 : vector<8x32xf32>
    %261 = arith.mulf %257, %245 : vector<8x32xf32>
    %262 = arith.mulf %256, %260 : vector<8x32xf32>
    %263 = arith.addf %261, %262 : vector<8x32xf32>
    %264 = math.tanh %263 : vector<8x32xf32>
    %265 = arith.mulf %258, %264 : vector<8x32xf32>
    %c48_83 = arith.constant 48 : index
    %c0_84 = arith.constant 0 : index
    %266 = vector.load %arg11[%c48_83, %c0_84] : memref<64x128xf32, #tpu.memory_space<vmem>>, vector<8x128xf32>
    %cst_85 = arith.constant dense<0.000000e+00> : vector<8x128xf32>
    %267 = tpu.matmul %265, %162, %cst_85 {dimension_numbers = #tpu.dot_dimension_numbers<[1], [0], [0], [1], [0, 0, 1, 1], [], []>} : vector<8x32xf32>, vector<32x128xf32>, vector<8x128xf32> -> vector<8x128xf32>
    %268 = arith.addf %266, %267 : vector<8x128xf32>
    %269 = arith.negf %268 : vector<8x128xf32>
    %270 = math.exp %269 : vector<8x128xf32>
    %cst_86 = arith.constant 1.000000e+00 : f32
    %271 = vector.broadcast %cst_86 : f32 to vector<8x128xf32>
    %272 = arith.addf %271, %270 : vector<8x128xf32>
    %273 = arith.divf %271, %272 : vector<8x128xf32>
    %274 = vector.extract_strided_slice %273 {offsets = [0, 0], sizes = [8, 32], strides = [1, 1]} : vector<8x128xf32> to vector<8x32xf32>
    %275 = vector.extract_strided_slice %273 {offsets = [0, 32], sizes = [8, 32], strides = [1, 1]} : vector<8x128xf32> to vector<8x32xf32>
    %276 = vector.extract_strided_slice %273 {offsets = [0, 96], sizes = [8, 32], strides = [1, 1]} : vector<8x128xf32> to vector<8x32xf32>
    %277 = vector.extract_strided_slice %268 {offsets = [0, 64], sizes = [8, 32], strides = [1, 1]} : vector<8x128xf32> to vector<8x32xf32>
    %278 = math.tanh %277 : vector<8x32xf32>
    %279 = arith.mulf %275, %263 : vector<8x32xf32>
    %280 = arith.mulf %274, %278 : vector<8x32xf32>
    %281 = arith.addf %279, %280 : vector<8x32xf32>
    %282 = math.tanh %281 : vector<8x32xf32>
    %283 = arith.mulf %276, %282 : vector<8x32xf32>
    %c56_87 = arith.constant 56 : index
    %c0_88 = arith.constant 0 : index
    %284 = vector.load %arg11[%c56_87, %c0_88] : memref<64x128xf32, #tpu.memory_space<vmem>>, vector<8x128xf32>
    %cst_89 = arith.constant dense<0.000000e+00> : vector<8x128xf32>
    %285 = tpu.matmul %283, %162, %cst_89 {dimension_numbers = #tpu.dot_dimension_numbers<[1], [0], [0], [1], [0, 0, 1, 1], [], []>} : vector<8x32xf32>, vector<32x128xf32>, vector<8x128xf32> -> vector<8x128xf32>
    %286 = arith.addf %284, %285 : vector<8x128xf32>
    %287 = arith.negf %286 : vector<8x128xf32>
    %288 = math.exp %287 : vector<8x128xf32>
    %cst_90 = arith.constant 1.000000e+00 : f32
    %289 = vector.broadcast %cst_90 : f32 to vector<8x128xf32>
    %290 = arith.addf %289, %288 : vector<8x128xf32>
    %291 = arith.divf %289, %290 : vector<8x128xf32>
    %292 = vector.extract_strided_slice %291 {offsets = [0, 0], sizes = [8, 32], strides = [1, 1]} : vector<8x128xf32> to vector<8x32xf32>
    %293 = vector.extract_strided_slice %291 {offsets = [0, 32], sizes = [8, 32], strides = [1, 1]} : vector<8x128xf32> to vector<8x32xf32>
    %294 = vector.extract_strided_slice %291 {offsets = [0, 96], sizes = [8, 32], strides = [1, 1]} : vector<8x128xf32> to vector<8x32xf32>
    %295 = vector.extract_strided_slice %286 {offsets = [0, 64], sizes = [8, 32], strides = [1, 1]} : vector<8x128xf32> to vector<8x32xf32>
    %296 = math.tanh %295 : vector<8x32xf32>
    %297 = arith.mulf %293, %281 : vector<8x32xf32>
    %298 = arith.mulf %292, %296 : vector<8x32xf32>
    %299 = arith.addf %297, %298 : vector<8x32xf32>
    %300 = math.tanh %299 : vector<8x32xf32>
    %301 = arith.mulf %294, %300 : vector<8x32xf32>
    %c0_91 = arith.constant 0 : index
    %c0_92 = arith.constant 0 : index
    %302 = vector.load %arg7[%c0_91, %c0_92] : memref<32x2xf32, #tpu.memory_space<vmem>>, vector<32x2xf32>
    %cst_93 = arith.constant dense<0.000000e+00> : vector<8x2xf32>
    %303 = tpu.matmul %301, %302, %cst_93 {dimension_numbers = #tpu.dot_dimension_numbers<[1], [0], [0], [1], [0, 0, 1, 1], [], []>} : vector<8x32xf32>, vector<32x2xf32>, vector<8x2xf32> -> vector<8x2xf32>
    %c0_94 = arith.constant 0 : index
    %c0_95 = arith.constant 0 : index
    %304 = vector.load %arg8[%c0_94, %c0_95] : memref<1x2xf32, #tpu.memory_space<vmem>>, vector<1x2xf32>
    %305 = vector.broadcast %304 : vector<1x2xf32> to vector<8x2xf32>
    %306 = arith.addf %303, %305 : vector<8x2xf32>
    %307 = arith.negf %306 : vector<8x2xf32>
    %308 = math.exp %307 : vector<8x2xf32>
    %cst_96 = arith.constant 1.000000e+00 : f32
    %309 = vector.broadcast %cst_96 : f32 to vector<8x2xf32>
    %310 = arith.addf %309, %308 : vector<8x2xf32>
    %311 = arith.divf %309, %310 : vector<8x2xf32>
    %c0_97 = arith.constant 0 : index
    %c0_98 = arith.constant 0 : index
    %312 = vector.load %arg9[%c0_97, %c0_98] : memref<8x2xf32, #tpu.memory_space<vmem>>, vector<8x2xf32>
    tpu.vector_store %arg9[%c0_97, %c0_98], %311 {strides = array<i32>} : memref<8x2xf32, #tpu.memory_space<vmem>>, vector<8x2xf32>,
    return
  }
}

</mosaic_0001>

<bundles_post_ra>
// kernel: tpu_custom_call.1
= control target key start
LH: loop header
LB: loop body
LE: loop exit
PB: predicated region body
PF: predicated region fallthrough
CT: control target
= control target key end

     0   :  { %vm73_vm0 = vcmask 1043456   ;;  %vm48_vm1 = vcmask 31744   ;;  %v2417_v14 = vmov 0.0   ;;  %vm2418_vm2 = vmmov 0   ;;  %s2420_s24 = smov 32   ;;  %s2875_s1 = inlined_call_operand.vmem [shape: f32[4,128], index: 1, kind: input, shape index: {}]   ;;  %s2876_s0 = inlined_call_operand.vmem [shape: f32[64,4], index: 0, kind: input, shape index: {}]   ;;  %s2877_s3 = inlined_call_operand.vmem [shape: f32[1,128], index: 3, kind: input, shape index: {}]   ;;  %s2878_s2 = inlined_call_operand.vmem [shape: f32[32,128], index: 2, kind: input, shape index: {}]   ;;  %s2879_s4 = inlined_call_operand.vmem [shape: f32[32,128], index: 4, kind: input, shape index: {}]   ;;  %s2880_s6 = inlined_call_operand.vmem [shape: f32[1,128], index: 6, kind: input, shape index: {}]   ;;  %s2881_s5 = inlined_call_operand.vmem [shape: f32[32,128], index: 5, kind: input, shape index: {}]   ;;  %s2882_s7 = inlined_call_operand.vmem [shape: f32[32,2], index: 7, kind: input, shape index: {}]   ;;  %s2883_s8 = inlined_call_operand.vmem [shape: f32[1,2], index: 8, kind: input, shape index: {}]   ;;  %s2884_s9 = inlined_call_operand.vmem [shape: f32[8,2], index: 9, kind: output, shape index: {}]  }
   0x1   :  { %v40_v0 = vld [vmem:[%s2875_s1] sm:$0xf]  ;;  %v33_v2 = vld [vmem:[%s2876_s0 + $0x8] sm:$0xff]  ;;  %s2416_s1 = smov 64   ;;  %2094 = vmatprep.subr.mxu1 %v2417_v14  ;;  %v2495_v15 = vld [vmem:[%s2878_s2 + $0x18] sm:$0xff]  ;;  %2102 = vmatprep.mubr.msk.f32.mxu1 %vm2418_vm2, %v2417_v14  ;;  %vm217_vm3 = vcmask 261120  }
   0x2   :  { %v32_v1 = vld [vmem:[%s2876_s0] sm:$0xff]  ;;  %2080 = vmatprep.subr.msk.mxu0 %vm73_vm0, %v40_v0  ;;  %v2500_v16 = vld [vmem:[%s2878_s2 + $0x10] sm:$0xff]  ;;  %2095 = vmatpush3.msra.mxu1 %v2495_v15  ;;  %v2510_v17 = vld [vmem:[%s2878_s2 + $0x8] sm:$0xff]  ;;  %vm1926_vm4 = vcmask 15360  }
   0x3   :  { %2082 = vmatprep.mubr.msk.f32.mxu0 %vm48_vm1, %v32_v1  ;;  %2081 = vmatpush3.msk.msra.mxu0 %vm73_vm0, %v40_v0  ;;  %v2487_v4 = vld [vmem:[%s2877_s3] ss:$0 sm:$0xff]  ;;  %v34_v38 = vld [vmem:[%s2876_s0 + $0x10] sm:$0xff]  ;;  %v35_v39 = vld [vmem:[%s2876_s0 + $0x18] sm:$0xff] }
   0x4   :  { %2083 = vmatmul.mubr.msk.f32.vlgmr.msra.gmra.mxu0 %vm48_vm1, %v33_v2  ;;  %2116 = vmatprep.subr.mxu0 %v2417_v14  ;;  %v2519_v18 = vld [vmem:[%s2878_s2] sm:$0xff]  ;;  %s2419_s2 = smov 96   ;;  %v37_v61 = vld [vmem:[%s2876_s0 + $0x28] sm:$0xff]  ;;  %v38_v62 = vld [vmem:[%s2876_s0 + $0x30] sm:$0xff] }
   0x5   :  { %2096 = vmatprep.subr.mxu1 %v2417_v14  ;;  %2117 = vmatpush3.msra.mxu0 %v2495_v15  ;;  %v36_v60 = vld [vmem:[%s2876_s0 + $0x20] sm:$0xff]  ;;  %v39_v63 = vld [vmem:[%s2876_s0 + $0x38] sm:$0xff] }
   0x6   :  { %2097 = vmatpush3.msra.mxu1 %v2500_v16  ;;  %2118 = vmatprep.subr.mxu0 %v2417_v14 }
   0x7   :  { %2098 = vmatprep.subr.mxu1 %v2417_v14  ;;  %2119 = vmatpush3.msra.mxu0 %v2500_v16 }
   0x8   :  { %2099 = vmatpush3.msra.mxu1 %v2510_v17  ;;  %2120 = vmatprep.subr.mxu0 %v2417_v14 }
   0x9   :  { %2100 = vmatprep.subr.mxu1 %v2417_v14  ;;  %2121 = vmatpush3.msra.mxu0 %v2510_v17 }
   0xa   :  { %2101 = vmatpush3.msra.mxu1 %v2519_v18  ;;  %2122 = vmatprep.subr.mxu0 %v2417_v14 }
   0xb   :  { %2105 = vmatprep.subr.mxu1 %v2417_v14  ;;  %2123 = vmatpush3.msra.mxu0 %v2519_v18 }
   0xc   :  { %2138 = vmatprep.subr.mxu0 %v2417_v14  ;;  %2085 = vmatprep.mubr.msk.f32.mxu0 %vm48_vm1, %v34_v38 }
   0xd   :  { %2086 = vmatmul.mubr.msk.f32.gmra.mxu0 %vm48_vm1, %v35_v39 }
   0xe   :  { %2088 = vmatprep.mubr.msk.f32.mxu0 %vm48_vm1, %v36_v60  ;;  %v955_v60 = vld [vmem:[%s2879_s4 + $0x18] sm:$0xff] }
  0x11   :  { %2089 = vmatmul.mubr.msk.f32.gmra.mxu0 %vm48_vm1, %v37_v61 }
  0x12   :  { %2091 = vmatprep.mubr.msk.f32.mxu0 %vm48_vm1, %v38_v62 }
  0x15   :  { %2092 = vmatmul.mubr.msk.f32.gmra.mxu0 %vm48_vm1, %v39_v63 }
  0x16   :  { %2124 = vmatprep.mubr.msk.f32.mxu0 %vm2418_vm2, %v2417_v14 }
  0xc4   :  { %v2482_v3 = vpop.f32.mrf.mxu0 }
  0xc5   :  { %v149_v23 = vadd.f32 %v2482_v3, %v2487_v4 }
  0xc6   :  { %v143_v5 = vpop.f32.mrf.mxu0 }
  0xc7   :  { %v144_v6 = vadd.f32 %v2487_v4, %v143_v5 }
  0xc9   :  { %2284 = vtanh.f32 %v144_v6  ;;  %v1942_v8 = vmul.f32 -1.442695, %v144_v6 }
  0xcb   :  { %2286 = vpow2.f32 %v1942_v8 }
  0xcd   :  { %v2087_v44 = vpop.f32.mrf.mxu0 }
  0xcf   :  { %v153_v45 = vpop.f32.mrf.mxu0 }
  0xd0   :  { %v154_v46 = vadd.f32 %v2487_v4, %v153_v45 }
  0xd1   :  { %v2607_v5 = vpop.f32.mrf.mxu0 }
  0xd3   :  { %v163_v6 = vpop.f32.mrf.mxu0 }
  0xd6   :  { %v2285_v7 = vpop.eup %2284 }
  0xd7   :  { %203 = vrot.lane.b32.xlu0 %v2285_v7, %s2416_s1  ;;  %v2609_v7 = vpop.f32.mrf.mxu0 }
  0xd8   :  { %v2287_v9 = vpop.eup %2286 }
  0xd9   :  { %v198_v10 = vadd.f32 1.0, %v2287_v9  ;;  %v2611_v8 = vpop.f32.mrf.mxu0  ;;  %v159_v9 = vadd.f32 %v2087_v44, %v2487_v4 }
  0xdb   :  { %2288 = vrcp.f32 %v198_v10 }
  0xe8   :  { %v2289_v11 = vpop.eup %2288 }
 0x149   :  { %v204_v12 = vpop.permute.xlu0 %203 }
 0x14a   :  { %v206_v13 = vmul.f32 %v2289_v11, %v204_v12 }
 0x14c   :  { %2290 = vtanh.f32 %v206_v13 }
 0x159   :  { %v2291_v19 = vpop.eup %2290 }
 0x15a   :  { %209 = vrot.lane.b32.xlu0 %v2291_v19, %s2419_s2 }
 0x15e   :  { %301 = vrot.lane.b32.xlu0 %v206_v13, %s2420_s24 }
 0x1cc   :  { %v210_v20 = vpop.permute.xlu0 %209 }
 0x1cd   :  { %v212_v21 = vmul.f32 %v2289_v11, %v210_v20 }
 0x1cf   :  { %214 = vrot.lane.b32.xlu1 %v212_v21, %s2420_s24 }
 0x1d0   :  { %v302_v34 = vpop.permute.xlu0 %301 }
 0x241   :  { %v215_v22 = vpop.permute.xlu1 %214 }
 0x242   :  { %218 = vst.msk [vmem:[#allocation2] sm:$0xff] %vm217_vm3, %v215_v22  ;;  %2103 = vmatmul.mubr.msk.f32.vlgmr.msra.gmra.mxu1 %vm217_vm3, %v215_v22 }
 0x243   :  { %2106 = vmatpush3.msra.mxu1 %v2495_v15  ;;  %2113 = vmatprep.mubr.msk.f32.mxu1 %vm2418_vm2, %v2417_v14 }
 0x244   :  { %2107 = vmatprep.subr.mxu1 %v2417_v14 }
 0x245   :  { %2108 = vmatpush3.msra.mxu1 %v2500_v16 }
 0x246   :  { %2109 = vmatprep.subr.mxu1 %v2417_v14 }
 0x247   :  { %2110 = vmatpush3.msra.mxu1 %v2510_v17 }
 0x248   :  { %2111 = vmatprep.subr.mxu1 %v2417_v14 }
 0x249   :  { %2112 = vmatpush3.msra.mxu1 %v2519_v18 }
 0x24a   :  { %2127 = vmatprep.subr.mxu1 %v2417_v14 }
 0x302   :  { %v288_v24 = vpop.f32.mrf.mxu1 }
 0x303   :  { %v292_v25 = vadd.f32 %v288_v24, %v149_v23 }
 0x304   :  { %v2104_v26 = vpop.f32.mrf.mxu1 }
 0x305   :  { %2292 = vtanh.f32 %v292_v25  ;;  %v1944_v28 = vmul.f32 -1.442695, %v292_v25 }
 0x307   :  { %2294 = vpow2.f32 %v1944_v28 }
 0x312   :  { %v2293_v27 = vpop.eup %2292 }
 0x313   :  { %306 = vrot.lane.b32.xlu1 %v2293_v27, %s2416_s1 }
 0x314   :  { %v2295_v29 = vpop.eup %2294 }
 0x315   :  { %v296_v30 = vadd.f32 1.0, %v2295_v29 }
 0x317   :  { %2296 = vrcp.f32 %v296_v30 }
 0x324   :  { %v2297_v31 = vpop.eup %2296 }
 0x325   :  { %v304_v35 = vmul.f32 %v2297_v31, %v302_v34 }
 0x385   :  { %v307_v32 = vpop.permute.xlu1 %306 }
 0x386   :  { %v309_v33 = vmul.f32 %v2297_v31, %v307_v32  ;;  %v164_v32 = vadd.f32 %v2487_v4, %v163_v6 }
 0x388   :  { %311 = vrot.lane.b32.xlu1 %v309_v33, %s2420_s24 }
 0x3fa   :  { %v312_v36 = vpop.permute.xlu1 %311 }
 0x3fb   :  { %v314_v37 = vadd.f32 %v312_v36, %v304_v35 }
 0x3fd   :  { %2298 = vtanh.f32 %v314_v37 }
 0x40a   :  { %v2299_v40 = vpop.eup %2298 }
 0x40b   :  { %317 = vrot.lane.b32.xlu0 %v2299_v40, %s2416_s1 }
 0x47d   :  { %v318_v41 = vpop.permute.xlu0 %317 }
 0x47e   :  { %v320_v42 = vmul.f32 %v2297_v31, %v318_v41 }
 0x480   :  { %322 = vrot.lane.b32.xlu1 %v320_v42, %s2420_s24 }
 0x4f2   :  { %v323_v43 = vpop.permute.xlu1 %322 }
 0x4f3   :  { %325 = vst.msk [vmem:[#allocation2 + $0x8] sm:$0xff] %vm217_vm3, %v323_v43  ;;  %2114 = vmatmul.mubr.msk.f32.vlgmr.msra.gmra.mxu1 %vm217_vm3, %v323_v43 }
 0x4f4   :  { %2128 = vmatpush3.msra.mxu1 %v2495_v15  ;;  %2135 = vmatprep.mubr.msk.f32.mxu1 %vm2418_vm2, %v2417_v14 }
 0x4f5   :  { %2129 = vmatprep.subr.mxu1 %v2417_v14 }
 0x4f6   :  { %2130 = vmatpush3.msra.mxu1 %v2500_v16 }
 0x4f7   :  { %2131 = vmatprep.subr.mxu1 %v2417_v14 }
 0x4f8   :  { %2132 = vmatpush3.msra.mxu1 %v2510_v17 }
 0x4f9   :  { %2133 = vmatprep.subr.mxu1 %v2417_v14 }
 0x4fa   :  { %2134 = vmatpush3.msra.mxu1 %v2519_v18  ;;  %v945_v6 = vld [vmem:[#allocation2 + $0x8] sm:$0xff] }
 0x4fb   :  { %2149 = vmatprep.subr.mxu1 %v2417_v14 }
 0x5b3   :  { %v395_v47 = vpop.f32.mrf.mxu1 }
 0x5b4   :  { %v399_v48 = vadd.f32 %v395_v47, %v154_v46 }
 0x5b5   :  { %v2115_v49 = vpop.f32.mrf.mxu1 }
 0x5b6   :  { %2300 = vtanh.f32 %v399_v48  ;;  %v1946_v51 = vmul.f32 -1.442695, %v399_v48 }
 0x5b8   :  { %2302 = vpow2.f32 %v1946_v51 }
 0x5c3   :  { %v2301_v50 = vpop.eup %2300 }
 0x5c4   :  { %409 = vrot.lane.b32.xlu0 %v2301_v50, %s2416_s1 }
 0x5c5   :  { %v2303_v52 = vpop.eup %2302 }
 0x5c6   :  { %v403_v53 = vadd.f32 1.0, %v2303_v52 }
 0x5c8   :  { %2304 = vrcp.f32 %v403_v53 }
 0x5d5   :  { %v2305_v54 = vpop.eup %2304 }
 0x5d6   :  { %v407_v57 = vmul.f32 %v2305_v54, %v314_v37 }
 0x636   :  { %v410_v55 = vpop.permute.xlu0 %409 }
 0x637   :  { %v412_v56 = vmul.f32 %v2305_v54, %v410_v55 }
 0x639   :  { %414 = vrot.lane.b32.xlu1 %v412_v56, %s2420_s24 }
 0x6ab   :  { %v415_v58 = vpop.permute.xlu1 %414 }
 0x6ac   :  { %v417_v59 = vadd.f32 %v415_v58, %v407_v57 }
 0x6ae   :  { %2306 = vtanh.f32 %v417_v59 }
 0x6bb   :  { %v2307_v0 = vpop.eup %2306 }
 0x6bc   :  { %420 = vrot.lane.b32.xlu0 %v2307_v0, %s2416_s1 }
 0x72e   :  { %v421_v1 = vpop.permute.xlu0 %420 }
 0x72f   :  { %v423_v2 = vmul.f32 %v2305_v54, %v421_v1  ;;  %v954_v1 = vld [vmem:[%s2879_s4 + $0x10] sm:$0xff] }
 0x731   :  { %425 = vrot.lane.b32.xlu1 %v423_v2, %s2420_s24  ;;  %v944_v2 = vld [vmem:[#allocation2] sm:$0xff] }
 0x7a3   :  { %v426_v3 = vpop.permute.xlu1 %425 }
 0x7a4   :  { %428 = vst.msk [vmem:[#allocation2 + $0x10] sm:$0xff] %vm217_vm3, %v426_v3  ;;  %2125 = vmatmul.mubr.msk.f32.vlgmr.msra.gmra.mxu0 %vm217_vm3, %v426_v3  ;;  %v953_v3 = vld [vmem:[%s2879_s4 + $0x8] sm:$0xff] }
 0x7a5   :  { %2139 = vmatpush3.msra.mxu0 %v2495_v15  ;;  %2146 = vmatprep.mubr.msk.f32.mxu0 %vm2418_vm2, %v2417_v14 }
 0x7a6   :  { %2140 = vmatprep.subr.mxu0 %v2417_v14 }
 0x7a7   :  { %2141 = vmatpush3.msra.mxu0 %v2500_v16 }
 0x7a8   :  { %2142 = vmatprep.subr.mxu0 %v2417_v14 }
 0x7a9   :  { %2143 = vmatpush3.msra.mxu0 %v2510_v17 }
 0x7aa   :  { %2144 = vmatprep.subr.mxu0 %v2417_v14 }
 0x7ab   :  { %2145 = vmatpush3.msra.mxu0 %v2519_v18 }
 0x7ac   :  { %2160 = vmatprep.subr.mxu0 %v2417_v14 }
 0x864   :  { %v498_v10 = vpop.f32.mrf.mxu0 }
 0x865   :  { %v502_v11 = vadd.f32 %v498_v10, %v159_v9  ;;  %v946_v9 = vld [vmem:[#allocation2 + $0x10] sm:$0xff] }
 0x866   :  { %v2126_v12 = vpop.f32.mrf.mxu0 }
 0x867   :  { %2308 = vtanh.f32 %v502_v11  ;;  %v1948_v19 = vmul.f32 -1.442695, %v502_v11 }
 0x869   :  { %2310 = vpow2.f32 %v1948_v19 }
 0x874   :  { %v2309_v13 = vpop.eup %2308 }
 0x875   :  { %512 = vrot.lane.b32.xlu0 %v2309_v13, %s2416_s1  ;;  %v174_v13 = vadd.f32 %v2487_v4, %v2611_v8 }
 0x876   :  { %v2311_v20 = vpop.eup %2310 }
 0x877   :  { %v506_v21 = vadd.f32 1.0, %v2311_v20 }
 0x879   :  { %2312 = vrcp.f32 %v506_v21 }
 0x886   :  { %v2313_v22 = vpop.eup %2312 }
 0x887   :  { %v510_v25 = vmul.f32 %v2313_v22, %v417_v59 }
 0x8e7   :  { %v513_v23 = vpop.permute.xlu0 %512 }
 0x8e8   :  { %v515_v24 = vmul.f32 %v2313_v22, %v513_v23  ;;  %v2683_v23 = vld [vmem:[%s2880_s6] ss:$0 sm:$0xff] }
 0x8ea   :  { %517 = vrot.lane.b32.xlu1 %v515_v24, %s2420_s24 }
 0x95c   :  { %v518_v26 = vpop.permute.xlu1 %517 }
 0x95d   :  { %v520_v27 = vadd.f32 %v518_v26, %v510_v25 }
 0x95f   :  { %2314 = vtanh.f32 %v520_v27 }
 0x96c   :  { %v2315_v28 = vpop.eup %2314 }
 0x96d   :  { %523 = vrot.lane.b32.xlu0 %v2315_v28, %s2416_s1 }
 0x9df   :  { %v524_v29 = vpop.permute.xlu0 %523 }
 0x9e0   :  { %v526_v30 = vmul.f32 %v2313_v22, %v524_v29 }
 0x9e2   :  { %528 = vrot.lane.b32.xlu1 %v526_v30, %s2420_s24 }
 0xa54   :  { %v529_v31 = vpop.permute.xlu1 %528 }
 0xa55   :  { %531 = vst.msk [vmem:[#allocation2 + $0x18] sm:$0xff] %vm217_vm3, %v529_v31  ;;  %2136 = vmatmul.mubr.msk.f32.vlgmr.msra.gmra.mxu1 %vm217_vm3, %v529_v31 }
 0xa56   :  { %2150 = vmatpush3.msra.mxu1 %v2495_v15  ;;  %2157 = vmatprep.mubr.msk.f32.mxu1 %vm2418_vm2, %v2417_v14 }
 0xa57   :  { %2151 = vmatprep.subr.mxu1 %v2417_v14 }
 0xa58   :  { %2152 = vmatpush3.msra.mxu1 %v2500_v16 }
 0xa59   :  { %2153 = vmatprep.subr.mxu1 %v2417_v14 }
 0xa5a   :  { %2154 = vmatpush3.msra.mxu1 %v2510_v17 }
 0xa5b   :  { %2155 = vmatprep.subr.mxu1 %v2417_v14 }
 0xa5c   :  { %2156 = vmatpush3.msra.mxu1 %v2519_v18  ;;  %v947_v10 = vld [vmem:[#allocation2 + $0x18] sm:$0xff] }
 0xa5d   :  { %2171 = vmatprep.subr.mxu1 %v955_v60 }
 0xb15   :  { %v601_v33 = vpop.f32.mrf.mxu1 }
 0xb16   :  { %v605_v34 = vadd.f32 %v601_v33, %v164_v32 }
 0xb17   :  { %v2137_v35 = vpop.f32.mrf.mxu1 }
 0xb18   :  { %2316 = vtanh.f32 %v605_v34  ;;  %v1950_v37 = vmul.f32 -1.442695, %v605_v34 }
 0xb1a   :  { %2318 = vpow2.f32 %v1950_v37 }
 0xb25   :  { %v2317_v36 = vpop.eup %2316 }
 0xb26   :  { %615 = vrot.lane.b32.xlu0 %v2317_v36, %s2416_s1 }
 0xb27   :  { %v2319_v38 = vpop.eup %2318 }
 0xb28   :  { %v609_v39 = vadd.f32 1.0, %v2319_v38 }
 0xb2a   :  { %2320 = vrcp.f32 %v609_v39 }
 0xb37   :  { %v2321_v40 = vpop.eup %2320 }
 0xb38   :  { %v613_v43 = vmul.f32 %v2321_v40, %v520_v27 }
 0xb98   :  { %v616_v41 = vpop.permute.xlu0 %615 }
 0xb99   :  { %v618_v42 = vmul.f32 %v2321_v40, %v616_v41 }
 0xb9b   :  { %620 = vrot.lane.b32.xlu1 %v618_v42, %s2420_s24 }
 0xc0d   :  { %v621_v44 = vpop.permute.xlu1 %620 }
 0xc0e   :  { %v623_v45 = vadd.f32 %v621_v44, %v613_v43 }
 0xc10   :  { %2322 = vtanh.f32 %v623_v45 }
 0xc1d   :  { %v2323_v46 = vpop.eup %2322 }
 0xc1e   :  { %626 = vrot.lane.b32.xlu0 %v2323_v46, %s2416_s1  ;;  %v2700_v46 = vld [vmem:[%s2881_s5 + $0x18] sm:$0xff] }
 0xc90   :  { %v627_v47 = vpop.permute.xlu0 %626 }
 0xc91   :  { %v629_v48 = vmul.f32 %v2321_v40, %v627_v47  ;;  %v2706_v47 = vld [vmem:[%s2881_s5 + $0x10] sm:$0xff] }
 0xc93   :  { %631 = vrot.lane.b32.xlu1 %v629_v48, %s2420_s24  ;;  %v2713_v48 = vld [vmem:[%s2881_s5 + $0x8] sm:$0xff] }
 0xd05   :  { %v632_v49 = vpop.permute.xlu1 %631 }
 0xd06   :  { %634 = vst.msk [vmem:[#allocation2 + $0x20] sm:$0xff] %vm217_vm3, %v632_v49  ;;  %2147 = vmatmul.mubr.msk.f32.vlgmr.msra.gmra.mxu0 %vm217_vm3, %v632_v49  ;;  %v2720_v49 = vld [vmem:[%s2881_s5] sm:$0xff] }
 0xd07   :  { %2161 = vmatpush3.msra.mxu0 %v2495_v15  ;;  %2168 = vmatprep.mubr.msk.f32.mxu0 %vm2418_vm2, %v2417_v14  ;;  %v169_v15 = vadd.f32 %v2607_v5, %v2487_v4  ;;  %v952_v5 = vld [vmem:[%s2879_s4] sm:$0xff] }
 0xd08   :  { %2162 = vmatprep.subr.mxu0 %v2417_v14 }
 0xd09   :  { %2163 = vmatpush3.msra.mxu0 %v2500_v16 }
 0xd0a   :  { %2164 = vmatprep.subr.mxu0 %v2417_v14 }
 0xd0b   :  { %2165 = vmatpush3.msra.mxu0 %v2510_v17 }
 0xd0c   :  { %2166 = vmatprep.subr.mxu0 %v2417_v14 }
 0xd0d   :  { %2167 = vmatpush3.msra.mxu0 %v2519_v18  ;;  %v948_v11 = vld [vmem:[#allocation2 + $0x20] sm:$0xff] }
 0xd0e   :  { %2191 = vmatprep.subr.mxu0 %v2417_v14 }
 0xdc6   :  { %v704_v50 = vpop.f32.mrf.mxu0 }
 0xdc7   :  { %v708_v51 = vadd.f32 %v704_v50, %v169_v15 }
 0xdc8   :  { %v2148_v52 = vpop.f32.mrf.mxu0 }
 0xdc9   :  { %2324 = vtanh.f32 %v708_v51  ;;  %v1952_v16 = vmul.f32 -1.442695, %v708_v51 }
 0xdcb   :  { %2326 = vpow2.f32 %v1952_v16  ;;  %v179_v16 = vadd.f32 %v2609_v7, %v2487_v4 }
 0xdd6   :  { %v2325_v53 = vpop.eup %2324 }
 0xdd7   :  { %718 = vrot.lane.b32.xlu0 %v2325_v53, %s2416_s1 }
 0xdd8   :  { %v2327_v54 = vpop.eup %2326 }
 0xdd9   :  { %v712_v17 = vadd.f32 1.0, %v2327_v54 }
 0xddb   :  { %2328 = vrcp.f32 %v712_v17 }
 0xde8   :  { %v2329_v55 = vpop.eup %2328 }
 0xde9   :  { %v716_v57 = vmul.f32 %v2329_v55, %v623_v45 }
 0xe49   :  { %v719_v56 = vpop.permute.xlu0 %718 }
 0xe4a   :  { %v721_v18 = vmul.f32 %v2329_v55, %v719_v56 }
 0xe4c   :  { %723 = vrot.lane.b32.xlu1 %v721_v18, %s2420_s24 }
 0xebe   :  { %v724_v58 = vpop.permute.xlu1 %723 }
 0xebf   :  { %v2650_v59 = vadd.f32 %v724_v58, %v716_v57 }
 0xec1   :  { %2330 = vtanh.f32 %v2650_v59 }
 0xece   :  { %v2331_v61 = vpop.eup %2330 }
 0xecf   :  { %729 = vrot.lane.b32.xlu0 %v2331_v61, %s2416_s1 }
 0xf41   :  { %v730_v62 = vpop.permute.xlu0 %729 }
 0xf42   :  { %v732_v63 = vmul.f32 %v2329_v55, %v730_v62 }
 0xf44   :  { %734 = vrot.lane.b32.xlu1 %v732_v63, %s2420_s24 }
 0xfb6   :  { %v735_v0 = vpop.permute.xlu1 %734 }
 0xfb7   :  { %737 = vst.msk [vmem:[#allocation2 + $0x28] sm:$0xff] %vm217_vm3, %v735_v0  ;;  %2158 = vmatmul.mubr.msk.f32.vlgmr.msra.gmra.mxu1 %vm217_vm3, %v735_v0 }
 0xfb8   :  { %2172 = vmatpush3.msra.mxu1 %v955_v60  ;;  %2179 = vmatprep.mubr.msk.f32.mxu1 %vm217_vm3, %v944_v2 }
 0xfb9   :  { %2173 = vmatprep.subr.mxu1 %v954_v1 }
 0xfba   :  { %2174 = vmatpush3.msra.mxu1 %v954_v1 }
 0xfbb   :  { %2175 = vmatprep.subr.mxu1 %v953_v3 }
 0xfbc   :  { %2176 = vmatpush3.msra.mxu1 %v953_v3 }
 0xfbd   :  { %2177 = vmatprep.subr.mxu1 %v952_v5 }
 0xfbe   :  { %2178 = vmatpush3.msra.mxu1 %v952_v5  ;;  %v949_v12 = vld [vmem:[#allocation2 + $0x28] sm:$0xff] }
 0xfbf   :  { %2180 = vmatmul.mubr.msk.f32.vlgmr.msra.gmra.mxu1 %vm217_vm3, %v945_v6  ;;  %2213 = vmatprep.subr.mxu1 %v2417_v14 }
 0xfc0   :  { %2182 = vmatprep.mubr.msk.f32.mxu1 %vm217_vm3, %v946_v9  ;;  %2214 = vmatpush3.msra.mxu1 %v2700_v46 }
 0xfc1   :  { %2215 = vmatprep.subr.mxu1 %v2417_v14 }
 0xfc2   :  { %2216 = vmatpush3.msra.mxu1 %v2706_v47 }
 0xfc3   :  { %2183 = vmatmul.mubr.msk.f32.gmra.mxu1 %vm217_vm3, %v947_v10  ;;  %2217 = vmatprep.subr.mxu1 %v2417_v14 }
 0xfc4   :  { %2185 = vmatprep.mubr.msk.f32.mxu1 %vm217_vm3, %v948_v11  ;;  %2218 = vmatpush3.msra.mxu1 %v2713_v48 }
 0xfc5   :  { %2219 = vmatprep.subr.mxu1 %v2417_v14 }
 0xfc6   :  { %2220 = vmatpush3.msra.mxu1 %v2720_v49 }
 0xfc7   :  { %2186 = vmatmul.mubr.msk.f32.gmra.mxu1 %vm217_vm3, %v949_v12  ;;  %2235 = vmatprep.subr.mxu1 %v2417_v14 }
0x1077   :  { %v807_v19 = vpop.f32.mrf.mxu1 }
0x1078   :  { %v811_v20 = vadd.f32 %v807_v19, %v174_v13 }
0x1079   :  { %v2159_v21 = vpop.f32.mrf.mxu1 }
0x107a   :  { %2332 = vtanh.f32 %v811_v20  ;;  %v1954_v8 = vmul.f32 -1.442695, %v811_v20 }
0x107f   :  { %v2678_v22 = vpop.f32.mrf.mxu1 }
0x1080   :  { %v1059_v56 = vadd.f32 %v2678_v22, %v2683_v23 }
0x1081   :  { %v1053_v24 = vpop.f32.mrf.mxu1 }
0x1082   :  { %v1054_v25 = vadd.f32 %v2683_v23, %v1053_v24 }
0x1084   :  { %2334 = vtanh.f32 %v1054_v25  ;;  %v1966_v28 = vmul.f32 -1.442695, %v1054_v25 }
0x1085   :  { %2336 = vpow2.f32 %v1954_v8 }
0x1086   :  { %2338 = vpow2.f32 %v1966_v28 }
0x1087   :  { %v2333_v26 = vpop.eup %2332 }
0x1088   :  { %821 = vrot.lane.b32.xlu0 %v2333_v26, %s2416_s1 }
0x1091   :  { %v2335_v27 = vpop.eup %2334 }
0x1092   :  { %1113 = vrot.lane.b32.xlu0 %v2335_v27, %s2416_s1  ;;  %v2337_v29 = vpop.eup %2336 }
0x1093   :  { %v815_v30 = vadd.f32 1.0, %v2337_v29  ;;  %v2339_v31 = vpop.eup %2338  ;;  %v2184_v29 = vpop.f32.mrf.mxu1 }
0x1094   :  { %v1108_v32 = vadd.f32 1.0, %v2339_v31 }
0x1095   :  { %2340 = vrcp.f32 %v815_v30  ;;  %v1063_v30 = vpop.f32.mrf.mxu1 }
0x1096   :  { %2342 = vrcp.f32 %v1108_v32  ;;  %v1064_v31 = vadd.f32 %v2683_v23, %v1063_v30 }
0x10a2   :  { %v2341_v33 = vpop.eup %2340 }
0x10a3   :  { %v2343_v36 = vpop.eup %2342  ;;  %v819_v40 = vmul.f32 %v2341_v33, %v2650_v59 }
0x10fa   :  { %v822_v34 = vpop.permute.xlu0 %821 }
0x10fb   :  { %v824_v35 = vmul.f32 %v2341_v33, %v822_v34 }
0x10fd   :  { %826 = vrot.lane.b32.xlu1 %v824_v35, %s2420_s24 }
0x1104   :  { %v1114_v37 = vpop.permute.xlu0 %1113 }
0x1105   :  { %v1116_v38 = vmul.f32 %v2343_v36, %v1114_v37 }
0x1107   :  { %2344 = vtanh.f32 %v1116_v38 }
0x1114   :  { %v2345_v39 = vpop.eup %2344 }
0x1115   :  { %1119 = vrot.lane.b32.xlu0 %v2345_v39, %s2419_s2 }
0x116f   :  { %v827_v41 = vpop.permute.xlu1 %826 }
0x1170   :  { %v2691_v42 = vadd.f32 %v827_v41, %v819_v40 }
0x1172   :  { %2346 = vtanh.f32 %v2691_v42 }
0x117f   :  { %v2347_v43 = vpop.eup %2346 }
0x1180   :  { %832 = vrot.lane.b32.xlu1 %v2347_v43, %s2416_s1 }
0x1187   :  { %v1120_v44 = vpop.permute.xlu0 %1119 }
0x1188   :  { %v1122_v45 = vmul.f32 %v2343_v36, %v1120_v44 }
0x118a   :  { %1125 = vrot.lane.b32.xlu0 %v1122_v45, %s2420_s24 }
0x118e   :  { %1208 = vrot.lane.b32.xlu0 %v1116_v38, %s2420_s24 }
0x11f2   :  { %v833_v15 = vpop.permute.xlu1 %832 }
0x11f3   :  { %v835_v50 = vmul.f32 %v2341_v33, %v833_v15 }
0x11f5   :  { %837 = vrot.lane.b32.xlu1 %v835_v50, %s2420_s24 }
0x11fc   :  { %v1126_v52 = vpop.permute.xlu0 %1125 }
0x1200   :  { %v1209_v0 = vpop.permute.xlu0 %1208 }
0x1267   :  { %v838_v51 = vpop.permute.xlu1 %837 }
0x1268   :  { %840 = vst.msk [vmem:[#allocation2 + $0x30] sm:$0xff] %vm217_vm3, %v838_v51  ;;  %2169 = vmatmul.mubr.msk.f32.vlgmr.msra.gmra.mxu0 %vm217_vm3, %v838_v51 }
0x1269   :  { %2192 = vmatpush3.msra.mxu0 %v2700_v46  ;;  %2199 = vmatprep.mubr.msk.f32.mxu0 %vm2418_vm2, %v2417_v14 }
0x126a   :  { %2193 = vmatprep.subr.mxu0 %v2417_v14 }
0x126b   :  { %2194 = vmatpush3.msra.mxu0 %v2706_v47 }
0x126c   :  { %2195 = vmatprep.subr.mxu0 %v2417_v14 }
0x126d   :  { %2196 = vmatpush3.msra.mxu0 %v2713_v48 }
0x126e   :  { %2197 = vmatprep.subr.mxu0 %v2417_v14 }
0x126f   :  { %2198 = vmatpush3.msra.mxu0 %v2720_v49  ;;  %v950_v53 = vld [vmem:[#allocation2 + $0x30] sm:$0xff] }
0x1270   :  { %2200 = vmatmul.mubr.msk.f32.vlgmr.msra.gmra.mxu0 %vm217_vm3, %v1126_v52  ;;  %2188 = vmatprep.mubr.msk.f32.mxu1 %vm217_vm3, %v950_v53 }
0x1271   :  { %2202 = vmatprep.subr.mxu0 %v2417_v14  ;;  %2210 = vmatprep.mubr.msk.f32.mxu0 %vm2418_vm2, %v2417_v14 }
0x1272   :  { %2203 = vmatpush3.msra.mxu0 %v2700_v46 }
0x1273   :  { %2204 = vmatprep.subr.mxu0 %v2417_v14 }
0x1274   :  { %2205 = vmatpush3.msra.mxu0 %v2706_v47 }
0x1275   :  { %2206 = vmatprep.subr.mxu0 %v2417_v14 }
0x1276   :  { %2207 = vmatpush3.msra.mxu0 %v2713_v48 }
0x1277   :  { %2208 = vmatprep.subr.mxu0 %v2417_v14 }
0x1278   :  { %2209 = vmatpush3.msra.mxu0 %v2720_v49 }
0x1279   :  { %2224 = vmatprep.subr.mxu0 %v2417_v14 }
0x1328   :  { %v910_v54 = vpop.f32.mrf.mxu0 }
0x1329   :  { %v914_v17 = vadd.f32 %v910_v54, %v179_v16  ;;  %v2794_v16 = vpop.f32.mrf.mxu1 }
0x132a   :  { %v2170_v55 = vpop.f32.mrf.mxu0 }
0x132b   :  { %v1956_v9 = vmul.f32 -1.442695, %v914_v17  ;;  %v1073_v54 = vpop.f32.mrf.mxu1 }
0x1330   :  { %v1195_v18 = vpop.f32.mrf.mxu0 }
0x1331   :  { %v1199_v57 = vadd.f32 %v1195_v18, %v1059_v56  ;;  %v1069_v56 = vadd.f32 %v2184_v29, %v2683_v23 }
0x1332   :  { %v2201_v58 = vpop.f32.mrf.mxu0 }
0x1333   :  { %2348 = vtanh.f32 %v1199_v57  ;;  %v1968_v60 = vmul.f32 -1.442695, %v1199_v57 }
0x1335   :  { %2350 = vpow2.f32 %v1968_v60 }
0x1340   :  { %v2349_v59 = vpop.eup %2348 }
0x1341   :  { %1213 = vrot.lane.b32.xlu1 %v2349_v59, %s2416_s1 }
0x1342   :  { %v2351_v61 = vpop.eup %2350 }
0x1343   :  { %v1203_v62 = vadd.f32 1.0, %v2351_v61 }
0x1345   :  { %2352 = vrcp.f32 %v1203_v62 }
0x1352   :  { %v2353_v63 = vpop.eup %2352 }
0x1353   :  { %v1211_v1 = vmul.f32 %v2353_v63, %v1209_v0 }
0x13b3   :  { %v1214_v4 = vpop.permute.xlu1 %1213 }
0x13b4   :  { %v1216_v7 = vmul.f32 %v2353_v63, %v1214_v4 }
0x13b6   :  { %1218 = vrot.lane.b32.xlu1 %v1216_v7, %s2420_s24 }
0x1428   :  { %v1219_v2 = vpop.permute.xlu1 %1218 }
0x1429   :  { %v1221_v3 = vadd.f32 %v1219_v2, %v1211_v1 }
0x142b   :  { %2354 = vtanh.f32 %v1221_v3 }
0x142c   :  { %2356 = vtanh.f32 %v914_v17 }
0x142d   :  { %2358 = vpow2.f32 %v1956_v9 }
0x1438   :  { %v2355_v5 = vpop.eup %2354 }
0x1439   :  { %1224 = vrot.lane.b32.xlu0 %v2355_v5, %s2416_s1  ;;  %v2357_v6 = vpop.eup %2356 }
0x143a   :  { %v2359_v10 = vpop.eup %2358 }
0x143b   :  { %v918_v11 = vadd.f32 1.0, %v2359_v10  ;;  %v1074_v10 = vadd.f32 %v2683_v23, %v1073_v54 }
0x143d   :  { %924 = vrot.lane.b32.xlu0 %v2357_v6, %s2416_s1  ;;  %2360 = vrcp.f32 %v918_v11 }
0x144a   :  { %v2361_v19 = vpop.eup %2360 }
0x144b   :  { %v922_v24 = vmul.f32 %v2361_v19, %v2691_v42 }
0x14ab   :  { %v1225_v12 = vpop.permute.xlu0 %1224 }
0x14ac   :  { %v1227_v13 = vmul.f32 %v2353_v63, %v1225_v12 }
0x14ae   :  { %1230 = vrot.lane.b32.xlu1 %v1227_v13, %s2420_s24 }
0x14af   :  { %v925_v20 = vpop.permute.xlu0 %924 }
0x14b0   :  { %v927_v21 = vmul.f32 %v2361_v19, %v925_v20 }
0x14b2   :  { %929 = vrot.lane.b32.xlu0 %v927_v21, %s2420_s24 }
0x1520   :  { %v1231_v22 = vpop.permute.xlu1 %1230 }
0x1521   :  { %2211 = vmatmul.mubr.msk.f32.vlgmr.msra.gmra.mxu0 %vm217_vm3, %v1231_v22 }
0x1522   :  { %2225 = vmatpush3.msra.mxu0 %v2700_v46  ;;  %2232 = vmatprep.mubr.msk.f32.mxu0 %vm2418_vm2, %v2417_v14 }
0x1523   :  { %2226 = vmatprep.subr.mxu0 %v2417_v14 }
0x1524   :  { %v930_v25 = vpop.permute.xlu0 %929  ;;  %2227 = vmatpush3.msra.mxu0 %v2706_v47 }
0x1525   :  { %v932_v26 = vadd.f32 %v930_v25, %v922_v24  ;;  %2228 = vmatprep.subr.mxu0 %v2417_v14 }
0x1526   :  { %2229 = vmatpush3.msra.mxu0 %v2713_v48 }
0x1527   :  { %2362 = vtanh.f32 %v932_v26  ;;  %2230 = vmatprep.subr.mxu0 %v2417_v14 }
0x1528   :  { %2231 = vmatpush3.msra.mxu0 %v2720_v49 }
0x1529   :  { %2246 = vmatprep.subr.mxu0 %v2417_v14 }
0x1534   :  { %v2363_v27 = vpop.eup %2362 }
0x1535   :  { %935 = vrot.lane.b32.xlu0 %v2363_v27, %s2416_s1 }
0x15a7   :  { %v936_v8 = vpop.permute.xlu0 %935 }
0x15a8   :  { %v938_v28 = vmul.f32 %v2361_v19, %v936_v8 }
0x15aa   :  { %940 = vrot.lane.b32.xlu0 %v938_v28, %s2420_s24 }
0x15e1   :  { %v1300_v32 = vpop.f32.mrf.mxu0 }
0x15e2   :  { %v1304_v33 = vadd.f32 %v1300_v32, %v1064_v31 }
0x15e3   :  { %v2212_v34 = vpop.f32.mrf.mxu0 }
0x15e4   :  { %2364 = vtanh.f32 %v1304_v33  ;;  %v1970_v38 = vmul.f32 -1.442695, %v1304_v33  ;;  %v1079_v33 = vadd.f32 %v2794_v16, %v2683_v23 }
0x15e6   :  { %2366 = vpow2.f32 %v1970_v38 }
0x15f1   :  { %v2365_v35 = vpop.eup %2364 }
0x15f2   :  { %1314 = vrot.lane.b32.xlu1 %v2365_v35, %s2416_s1 }
0x15f3   :  { %v2367_v39 = vpop.eup %2366 }
0x15f4   :  { %v1308_v40 = vadd.f32 1.0, %v2367_v39 }
0x15f6   :  { %2368 = vrcp.f32 %v1308_v40 }
0x1603   :  { %v2369_v41 = vpop.eup %2368 }
0x1604   :  { %v1312_v44 = vmul.f32 %v2369_v41, %v1221_v3 }
0x161c   :  { %v941_v36 = vpop.permute.xlu0 %940 }
0x161d   :  { %943 = vst.msk [vmem:[#allocation2 + $0x38] sm:$0xff] %vm217_vm3, %v941_v36 }
0x1624   :  { %v951_v37 = vld [vmem:[#allocation2 + $0x38] sm:$0xff] }
0x1625   :  { %2189 = vmatmul.mubr.msk.f32.gmra.mxu1 %vm217_vm3, %v951_v37 }
0x1626   :  { %2221 = vmatprep.mubr.msk.f32.mxu1 %vm2418_vm2, %v2417_v14 }
0x1664   :  { %v1315_v42 = vpop.permute.xlu1 %1314 }
0x1665   :  { %v1317_v43 = vmul.f32 %v2369_v41, %v1315_v42 }
0x1667   :  { %1319 = vrot.lane.b32.xlu1 %v1317_v43, %s2420_s24 }
0x16d9   :  { %v1320_v45 = vpop.permute.xlu1 %1319 }
0x16da   :  { %v1322_v15 = vadd.f32 %v1320_v45, %v1312_v44 }
0x16dc   :  { %2370 = vtanh.f32 %v1322_v15 }
0x16e5   :  { %v2796_v17 = vpop.f32.mrf.mxu1 }
0x16e7   :  { %v2798_v55 = vpop.f32.mrf.mxu1 }
0x16e9   :  { %v2371_v50 = vpop.eup %2370 }
0x16ea   :  { %1325 = vrot.lane.b32.xlu1 %v2371_v50, %s2416_s1  ;;  %v1084_v50 = vadd.f32 %v2683_v23, %v2798_v55 }
0x175c   :  { %v1326_v51 = vpop.permute.xlu1 %1325 }
0x175d   :  { %v1328_v52 = vmul.f32 %v2369_v41, %v1326_v51 }
0x175f   :  { %1331 = vrot.lane.b32.xlu1 %v1328_v52, %s2420_s24 }
0x17d1   :  { %v1332_v53 = vpop.permute.xlu1 %1331 }
0x17d2   :  { %2222 = vmatmul.mubr.msk.f32.vlgmr.msra.gmra.mxu1 %vm217_vm3, %v1332_v53 }
0x17d3   :  { %2236 = vmatpush3.msra.mxu1 %v2700_v46  ;;  %2243 = vmatprep.mubr.msk.f32.mxu1 %vm2418_vm2, %v2417_v14 }
0x17d4   :  { %2237 = vmatprep.subr.mxu1 %v2417_v14 }
0x17d5   :  { %2238 = vmatpush3.msra.mxu1 %v2706_v47 }
0x17d6   :  { %2239 = vmatprep.subr.mxu1 %v2417_v14 }
0x17d7   :  { %2240 = vmatpush3.msra.mxu1 %v2713_v48 }
0x17d8   :  { %2241 = vmatprep.subr.mxu1 %v2417_v14 }
0x17d9   :  { %2242 = vmatpush3.msra.mxu1 %v2720_v49 }
0x17da   :  { %2257 = vmatprep.subr.mxu1 %v2417_v14 }
0x1892   :  { %v1401_v18 = vpop.f32.mrf.mxu1 }
0x1893   :  { %v1405_v57 = vadd.f32 %v1401_v18, %v1069_v56 }
0x1894   :  { %v2223_v58 = vpop.f32.mrf.mxu1 }
0x1895   :  { %2372 = vtanh.f32 %v1405_v57  ;;  %v1972_v60 = vmul.f32 -1.442695, %v1405_v57 }
0x1897   :  { %2374 = vpow2.f32 %v1972_v60 }
0x18a2   :  { %v2373_v59 = vpop.eup %2372 }
0x18a3   :  { %1415 = vrot.lane.b32.xlu0 %v2373_v59, %s2416_s1 }
0x18a4   :  { %v2375_v61 = vpop.eup %2374 }
0x18a5   :  { %v1409_v62 = vadd.f32 1.0, %v2375_v61 }
0x18a7   :  { %2376 = vrcp.f32 %v1409_v62 }
0x18b4   :  { %v2377_v63 = vpop.eup %2376 }
0x18b5   :  { %v1413_v0 = vmul.f32 %v2377_v63, %v1322_v15 }
0x1915   :  { %v1416_v4 = vpop.permute.xlu0 %1415 }
0x1916   :  { %v1418_v7 = vmul.f32 %v2377_v63, %v1416_v4 }
0x1918   :  { %1420 = vrot.lane.b32.xlu1 %v1418_v7, %s2420_s24 }
0x198a   :  { %v1421_v1 = vpop.permute.xlu1 %1420 }
0x198b   :  { %v1423_v2 = vadd.f32 %v1421_v1, %v1413_v0  ;;  %v1089_v0 = vadd.f32 %v2796_v17, %v2683_v23  ;;  %v1837_v17 = vld [vmem:[%s2882_s7 + $0x18] sm:$0xff] }
0x198d   :  { %2378 = vtanh.f32 %v1423_v2 }
0x199a   :  { %v2379_v3 = vpop.eup %2378 }
0x199b   :  { %1426 = vrot.lane.b32.xlu0 %v2379_v3, %s2416_s1 }
0x1a0d   :  { %v1427_v5 = vpop.permute.xlu0 %1426 }
0x1a0e   :  { %v1429_v6 = vmul.f32 %v2377_v63, %v1427_v5 }
0x1a10   :  { %1432 = vrot.lane.b32.xlu1 %v1429_v6, %s2420_s24 }
0x1a82   :  { %v1433_v9 = vpop.permute.xlu1 %1432 }
0x1a83   :  { %2233 = vmatmul.mubr.msk.f32.vlgmr.msra.gmra.mxu0 %vm217_vm3, %v1433_v9 }
0x1a84   :  { %2247 = vmatpush3.msra.mxu0 %v2700_v46  ;;  %2254 = vmatprep.mubr.msk.f32.mxu0 %vm2418_vm2, %v2417_v14 }
0x1a85   :  { %2248 = vmatprep.subr.mxu0 %v2417_v14 }
0x1a86   :  { %2249 = vmatpush3.msra.mxu0 %v2706_v47 }
0x1a87   :  { %2250 = vmatprep.subr.mxu0 %v2417_v14 }
0x1a88   :  { %2251 = vmatpush3.msra.mxu0 %v2713_v48 }
0x1a89   :  { %2252 = vmatprep.subr.mxu0 %v2417_v14 }
0x1a8a   :  { %2253 = vmatpush3.msra.mxu0 %v2720_v49 }
0x1a8b   :  { %2268 = vmatprep.subr.mxu0 %v2417_v14 }
0x1b43   :  { %v1502_v11 = vpop.f32.mrf.mxu0 }
0x1b44   :  { %v1506_v12 = vadd.f32 %v1502_v11, %v1074_v10 }
0x1b45   :  { %v2234_v13 = vpop.f32.mrf.mxu0 }
0x1b46   :  { %2380 = vtanh.f32 %v1506_v12  ;;  %v1974_v20 = vmul.f32 -1.442695, %v1506_v12 }
0x1b48   :  { %2382 = vpow2.f32 %v1974_v20 }
0x1b53   :  { %v2381_v19 = vpop.eup %2380 }
0x1b54   :  { %1516 = vrot.lane.b32.xlu0 %v2381_v19, %s2416_s1 }
0x1b55   :  { %v2383_v21 = vpop.eup %2382 }
0x1b56   :  { %v1510_v22 = vadd.f32 1.0, %v2383_v21  ;;  %v1836_v21 = vld [vmem:[%s2882_s7 + $0x10] sm:$0xff] }
0x1b58   :  { %2384 = vrcp.f32 %v1510_v22  ;;  %v1835_v22 = vld [vmem:[%s2882_s7 + $0x8] sm:$0xff] }
0x1b65   :  { %v2385_v24 = vpop.eup %2384 }
0x1b66   :  { %v1514_v27 = vmul.f32 %v2385_v24, %v1423_v2 }
0x1bc6   :  { %v1517_v25 = vpop.permute.xlu0 %1516 }
0x1bc7   :  { %v1519_v26 = vmul.f32 %v2385_v24, %v1517_v25 }
0x1bc9   :  { %1521 = vrot.lane.b32.xlu1 %v1519_v26, %s2420_s24 }
0x1c3b   :  { %v1522_v8 = vpop.permute.xlu1 %1521 }
0x1c3c   :  { %v1524_v28 = vadd.f32 %v1522_v8, %v1514_v27 }
0x1c3e   :  { %2386 = vtanh.f32 %v1524_v28 }
0x1c4b   :  { %v2387_v29 = vpop.eup %2386 }
0x1c4c   :  { %1527 = vrot.lane.b32.xlu0 %v2387_v29, %s2416_s1 }
0x1cbe   :  { %v1528_v30 = vpop.permute.xlu0 %1527 }
0x1cbf   :  { %v1530_v31 = vmul.f32 %v2385_v24, %v1528_v30  ;;  %v1834_v24 = vld [vmem:[%s2882_s7] sm:$0xff] }
0x1cc1   :  { %1533 = vrot.lane.b32.xlu1 %v1530_v31, %s2420_s24 }
0x1d33   :  { %v1534_v32 = vpop.permute.xlu1 %1533 }
0x1d34   :  { %2244 = vmatmul.mubr.msk.f32.vlgmr.msra.gmra.mxu1 %vm217_vm3, %v1534_v32 }
0x1d35   :  { %2258 = vmatpush3.msra.mxu1 %v2700_v46  ;;  %2265 = vmatprep.mubr.msk.f32.mxu1 %vm2418_vm2, %v2417_v14 }
0x1d36   :  { %2259 = vmatprep.subr.mxu1 %v2417_v14 }
0x1d37   :  { %2260 = vmatpush3.msra.mxu1 %v2706_v47 }
0x1d38   :  { %2261 = vmatprep.subr.mxu1 %v2417_v14 }
0x1d39   :  { %2262 = vmatpush3.msra.mxu1 %v2713_v48 }
0x1d3a   :  { %2263 = vmatprep.subr.mxu1 %v2417_v14 }
0x1d3b   :  { %2264 = vmatpush3.msra.mxu1 %v2720_v49 }
0x1df4   :  { %v1603_v34 = vpop.f32.mrf.mxu1 }
0x1df5   :  { %v1607_v46 = vadd.f32 %v1603_v34, %v1079_v33 }
0x1df6   :  { %v2245_v35 = vpop.f32.mrf.mxu1 }
0x1df7   :  { %2388 = vtanh.f32 %v1607_v46  ;;  %v1976_v37 = vmul.f32 -1.442695, %v1607_v46 }
0x1df9   :  { %2390 = vpow2.f32 %v1976_v37 }
0x1e04   :  { %v2389_v36 = vpop.eup %2388 }
0x1e05   :  { %1617 = vrot.lane.b32.xlu0 %v2389_v36, %s2416_s1 }
0x1e06   :  { %v2391_v47 = vpop.eup %2390 }
0x1e07   :  { %v1611_v38 = vadd.f32 1.0, %v2391_v47 }
0x1e09   :  { %2392 = vrcp.f32 %v1611_v38 }
0x1e16   :  { %v2393_v48 = vpop.eup %2392 }
0x1e17   :  { %v1615_v49 = vmul.f32 %v2393_v48, %v1524_v28  ;;  %v1981_v28 = vld [vmem:[%s2883_s8] ss:$0 sm:$0xff] }
0x1e77   :  { %v1618_v39 = vpop.permute.xlu0 %1617 }
0x1e78   :  { %v1620_v40 = vmul.f32 %v2393_v48, %v1618_v39 }
0x1e7a   :  { %1622 = vrot.lane.b32.xlu1 %v1620_v40, %s2420_s24 }
0x1eec   :  { %v1623_v41 = vpop.permute.xlu1 %1622 }
0x1eed   :  { %v1625_v42 = vadd.f32 %v1623_v41, %v1615_v49 }
0x1eef   :  { %2394 = vtanh.f32 %v1625_v42 }
0x1efc   :  { %v2395_v43 = vpop.eup %2394 }
0x1efd   :  { %1628 = vrot.lane.b32.xlu0 %v2395_v43, %s2416_s1 }
0x1f6f   :  { %v1629_v44 = vpop.permute.xlu0 %1628 }
0x1f70   :  { %v1631_v45 = vmul.f32 %v2393_v48, %v1629_v44 }
0x1f72   :  { %1634 = vrot.lane.b32.xlu1 %v1631_v45, %s2420_s24 }
0x1fe4   :  { %v1635_v15 = vpop.permute.xlu1 %1634 }
0x1fe5   :  { %2255 = vmatmul.mubr.msk.f32.vlgmr.msra.gmra.mxu0 %vm217_vm3, %v1635_v15 }
0x1fe6   :  { %2276 = vmatprep.mubr.msk.f32.mxu0 %vm2418_vm2, %v2417_v14  ;;  %2269 = vmatpush3.msra.mxu0 %v1837_v17 }
0x1fe7   :  { %2270 = vmatprep.subr.mxu0 %v2417_v14 }
0x1fe8   :  { %2271 = vmatpush3.msra.mxu0 %v1836_v21 }
0x1fe9   :  { %2272 = vmatprep.subr.mxu0 %v2417_v14 }
0x1fea   :  { %2273 = vmatpush3.msra.mxu0 %v1835_v22 }
0x1feb   :  { %2274 = vmatprep.subr.mxu0 %v2417_v14 }
0x1fec   :  { %2275 = vmatpush3.msra.mxu0 %v1834_v24 }
0x20a5   :  { %v1704_v51 = vpop.f32.mrf.mxu0 }
0x20a6   :  { %v1708_v52 = vadd.f32 %v1704_v51, %v1084_v50 }
0x20a7   :  { %v2256_v53 = vpop.f32.mrf.mxu0 }
0x20a8   :  { %2396 = vtanh.f32 %v1708_v52  ;;  %v1978_v54 = vmul.f32 -1.442695, %v1708_v52 }
0x20aa   :  { %2398 = vpow2.f32 %v1978_v54 }
0x20b5   :  { %v2397_v16 = vpop.eup %2396 }
0x20b6   :  { %1718 = vrot.lane.b32.xlu0 %v2397_v16, %s2416_s1 }
0x20b7   :  { %v2399_v56 = vpop.eup %2398 }
0x20b8   :  { %v1712_v18 = vadd.f32 1.0, %v2399_v56 }
0x20ba   :  { %2400 = vrcp.f32 %v1712_v18 }
0x20c7   :  { %v2401_v57 = vpop.eup %2400 }
0x20c8   :  { %v1716_v60 = vmul.f32 %v2401_v57, %v1625_v42 }
0x2128   :  { %v1719_v58 = vpop.permute.xlu0 %1718 }
0x2129   :  { %v1721_v59 = vmul.f32 %v2401_v57, %v1719_v58 }
0x212b   :  { %1723 = vrot.lane.b32.xlu1 %v1721_v59, %s2420_s24 }
0x219d   :  { %v1724_v61 = vpop.permute.xlu1 %1723 }
0x219e   :  { %v1726_v55 = vadd.f32 %v1724_v61, %v1716_v60 }
0x21a0   :  { %2402 = vtanh.f32 %v1726_v55 }
0x21ad   :  { %v2403_v62 = vpop.eup %2402 }
0x21ae   :  { %1729 = vrot.lane.b32.xlu0 %v2403_v62, %s2416_s1 }
0x2220   :  { %v1730_v63 = vpop.permute.xlu0 %1729 }
0x2221   :  { %v1732_v4 = vmul.f32 %v2401_v57, %v1730_v63 }
0x2223   :  { %1735 = vrot.lane.b32.xlu1 %v1732_v4, %s2420_s24 }
0x2295   :  { %v1736_v7 = vpop.permute.xlu1 %1735 }
0x2296   :  { %2266 = vmatmul.mubr.msk.f32.vlgmr.msra.gmra.mxu1 %vm217_vm3, %v1736_v7 }
0x2356   :  { %v1805_v1 = vpop.f32.mrf.mxu1 }
0x2357   :  { %v1809_v2 = vadd.f32 %v1805_v1, %v1089_v0 }
0x2358   :  { %v2267_v3 = vpop.f32.mrf.mxu1 }
0x2359   :  { %2404 = vtanh.f32 %v1809_v2  ;;  %v1980_v6 = vmul.f32 -1.442695, %v1809_v2 }
0x235b   :  { %2406 = vpow2.f32 %v1980_v6 }
0x2366   :  { %v2405_v5 = vpop.eup %2404 }
0x2367   :  { %1819 = vrot.lane.b32.xlu0 %v2405_v5, %s2416_s1 }
0x2368   :  { %v2407_v9 = vpop.eup %2406 }
0x2369   :  { %v1813_v10 = vadd.f32 1.0, %v2407_v9 }
0x236b   :  { %2408 = vrcp.f32 %v1813_v10 }
0x2378   :  { %v2409_v11 = vpop.eup %2408 }
0x2379   :  { %v1817_v19 = vmul.f32 %v2409_v11, %v1726_v55 }
0x23d9   :  { %v1820_v12 = vpop.permute.xlu0 %1819 }
0x23da   :  { %v1822_v13 = vmul.f32 %v2409_v11, %v1820_v12 }
0x23dc   :  { %1824 = vrot.lane.b32.xlu1 %v1822_v13, %s2420_s24 }
0x244e   :  { %v1825_v20 = vpop.permute.xlu1 %1824 }
0x244f   :  { %v1827_v23 = vadd.f32 %v1825_v20, %v1817_v19 }
0x2451   :  { %2410 = vtanh.f32 %v1827_v23 }
0x245e   :  { %v2411_v25 = vpop.eup %2410 }
0x245f   :  { %1830 = vrot.lane.b32.xlu0 %v2411_v25, %s2416_s1 }
0x24d1   :  { %v1831_v26 = vpop.permute.xlu0 %1830 }
0x24d2   :  { %v1833_v27 = vmul.f32 %v2409_v11, %v1831_v26 }
0x24d4   :  { %1846 = vrot.lane.b32.xlu1 %v1833_v27, %s2420_s24 }
0x2546   :  { %v1847_v8 = vpop.permute.xlu1 %1846 }
0x2547   :  { %2277 = vmatmul.mubr.msk.f32.vlgmr.msra.gmra.mxu0 %vm217_vm3, %v1847_v8 }
0x2607   :  { %v1916_v29 = vpop.f32.mrf.mxu0 }
0x2608   :  { %v1917_v30 = vadd.f32 %v1981_v28, %v1916_v29 }
0x2609   :  { %v2278_v31 = vpop.f32.mrf.mxu0 }
0x260a   :  { %v1983_v32 = vmul.f32 -1.442695, %v1917_v30 }
0x260c   :  { %2412 = vpow2.f32 %v1983_v32 }
0x2619   :  { %v2413_v14 = vpop.eup %2412 }
0x261a   :  { %v1923_v33 = vadd.f32 1.0, %v2413_v14 }
0x261c   :  { %2414 = vrcp.f32 %v1923_v33 }
0x2629   :  { %v2415_v34 = vpop.eup %2414 }
0x262a   :  { %1927 = vst.msk [vmem:[%s2884_s9] sm:$0xff] %vm1926_vm4, %v2415_v34 }

</bundles_post_ra>
